<compile_context>
chip_gen: v5e
topology: v5e:2x2
jax: 0.10.0
libtpu: 0.0.40
codegen_flags: <defaults>
</compile_context>

<pallas_src>
import math
from functools import partial

import jax
import jax.numpy as jnp
from jax.experimental import pallas as pl
from jax.experimental.pallas import tpu as pltpu

LN_EPS = 1e-5  # config.layer_norm_epsilon


# ------------------------------ tiling helpers ------------------------------

def _pick_tile(dim, target, align):
    """Largest multiple of `align` <= target that divides dim, else full dim."""
    if dim <= target:
        return dim
    t = (target // align) * align
    while t >= align:
        if dim % t == 0:
            return t
        t -= align
    return dim


def _compiler_params(dims):
    return pltpu.CompilerParams(
        dimension_semantics=dims,
        vmem_limit_bytes=32 * 1024 * 1024,
    )


# ------------------------------ kernel bodies -------------------------------

def _gelu(x):
    # 0.5 * x * (1 + tanh(sqrt(2/pi) * (x + 0.044715 * x^3)))   (gelu_new)
    return 0.5 * x * (1.0 + jnp.tanh(0.7978845608028654 * (x + 0.044715 * x * x * x)))


def _matmul_kernel(activation, has_residual, *refs):
    """Tiled Conv1D: out = act(x @ W + b) [+ residual]; K axis accumulated."""
    if has_residual:
        x_ref, w_ref, b_ref, r_ref, o_ref, acc_ref = refs
    else:
        x_ref, w_ref, b_ref, o_ref, acc_ref = refs
        r_ref = None

    @pl.when(pl.program_id(2) == 0)
    def _():
        acc_ref[...] = jnp.zeros_like(acc_ref)

    acc_ref[...] += jnp.dot(
        x_ref[...].astype(jnp.bfloat16),
        w_ref[...].astype(jnp.bfloat16),
        preferred_element_type=jnp.float32)

    @pl.when(pl.program_id(2) == pl.num_programs(2) - 1)
    def _():
        y = acc_ref[...] + b_ref[...].astype(jnp.float32)
        if activation == "gelu":
            y = _gelu(y)
        if r_ref is not None:
            y = y + r_ref[...].astype(jnp.float32)   # fused residual add
        o_ref[...] = y.astype(o_ref.dtype)


def _ln_kernel(x_ref, g_ref, b_ref, o_ref):
    x = x_ref[...].astype(jnp.float32)
    mean = jnp.mean(x, axis=-1, keepdims=True)
    var = jnp.mean(jnp.square(x - mean), axis=-1, keepdims=True)
    y = (x - mean) * jax.lax.rsqrt(var + LN_EPS)
    o_ref[...] = (y * g_ref[...] + b_ref[...]).astype(o_ref.dtype)


def _attn_kernel(scale, q_ref, k_ref, v_ref, bias_ref, o_ref):
    """One (batch*head, q-tile) step: scores over full S, softmax, weighted V."""
    q = q_ref[0].astype(jnp.bfloat16)      # (tq, Dh)
    k = k_ref[0].astype(jnp.bfloat16)      # (S, Dh)
    v = v_ref[0].astype(jnp.bfloat16)      # (S, Dh)

    # scores = q @ k^T / sqrt(Dh) + additive mask bias (0 / -10000)
    s = jax.lax.dot_general(q, k, (((1,), (1,)), ((), ())),
                            preferred_element_type=jnp.float32)
    s = s * scale + bias_ref[...]

    m = jnp.max(s, axis=-1, keepdims=True)
    e = jnp.exp(s - m)
    p = e * pl.reciprocal(jnp.sum(e, axis=-1, keepdims=True), approx=True)

    o = jnp.dot(p.astype(jnp.bfloat16), v, preferred_element_type=jnp.float32)
    o_ref[0] = o.astype(o_ref.dtype)


# ------------------------------ pallas wrappers ------------------------------

def matmul(x, w, b, *, activation="none", residual=None,
           tm=256, tn=256, tk=512, out_dtype=jnp.float32):
    M, K = x.shape
    _, N = w.shape
    tm = _pick_tile(M, tm, 8)
    tn = _pick_tile(N, tn, 128)
    tk = _pick_tile(K, tk, 128)
    grid = (M // tm, N // tn, K // tk)

    in_specs = [
        pl.BlockSpec((tm, tk), lambda i, j, k: (i, k)),
        pl.BlockSpec((tk, tn), lambda i, j, k: (k, j)),
        pl.BlockSpec((1, tn), lambda i, j, k: (0, j)),
    ]
    args = [x, w, b]
    if residual is not None:
        in_specs.append(pl.BlockSpec((tm, tn), lambda i, j, k: (i, j)))
        args.append(residual)

    return pl.pallas_call(
        partial(_matmul_kernel, activation, residual is not None),
        out_shape=jax.ShapeDtypeStruct((M, N), out_dtype),
        grid_spec=pltpu.PrefetchScalarGridSpec(
            num_scalar_prefetch=0,
            grid=grid,
            in_specs=in_specs,
            out_specs=pl.BlockSpec((tm, tn), lambda i, j, k: (i, j)),
            scratch_shapes=[pltpu.VMEM((tm, tn), jnp.float32)],
        ),
        compiler_params=_compiler_params(("parallel", "parallel", "arbitrary")),
    )(*args)


def layer_norm(x, g, b, *, tm=256):
    M, D = x.shape
    tm = _pick_tile(M, tm, 8)
    return pl.pallas_call(
        _ln_kernel,
        out_shape=jax.ShapeDtypeStruct((M, D), x.dtype),
        grid_spec=pltpu.PrefetchScalarGridSpec(
            num_scalar_prefetch=0,
            grid=(M // tm,),
            in_specs=[pl.BlockSpec((tm, D), lambda i: (i, 0)),
                      pl.BlockSpec((1, D), lambda i: (0, 0)),
                      pl.BlockSpec((1, D), lambda i: (0, 0))],
            out_specs=pl.BlockSpec((tm, D), lambda i: (i, 0)),
        ),
        compiler_params=_compiler_params(("parallel",)),
    )(x, g, b)


def attention(q, k, v, bias, *, tq=128):
    """q, k, v: (B*H, S, Dh) head-major; bias: (S, S) additive mask."""
    BH, S, Dh = q.shape
    tq = _pick_tile(S, tq, 8)
    scale = 1.0 / math.sqrt(Dh)
    # TODO(synk): for very long S, tile K/V with an online-softmax (flash) loop
    # instead of keeping the full (S, Dh) K/V per grid step.
    return pl.pallas_call(
        partial(_attn_kernel, scale),
        out_shape=jax.ShapeDtypeStruct((BH, S, Dh), jnp.float32),
        grid_spec=pltpu.PrefetchScalarGridSpec(
            num_scalar_prefetch=0,
            grid=(BH, S // tq),
            in_specs=[pl.BlockSpec((1, tq, Dh), lambda bh, qi: (bh, qi, 0)),
                      pl.BlockSpec((1, S, Dh), lambda bh, qi: (bh, 0, 0)),
                      pl.BlockSpec((1, S, Dh), lambda bh, qi: (bh, 0, 0)),
                      pl.BlockSpec((tq, S), lambda bh, qi: (qi, 0))],
            out_specs=pl.BlockSpec((1, tq, Dh), lambda bh, qi: (bh, qi, 0)),
        ),
        compiler_params=_compiler_params(("parallel", "parallel")),
    )(q, k, v, bias)


# --------------------------------- model -----------------------------------

def transformer_block(x2d, bias, layer, n_head, B, S):
    M, D = x2d.shape
    H = n_head
    Dh = D // H

    # ---- ln_1 + attention ----
    h1 = layer_norm(x2d, layer['ln1_g'], layer['ln1_b'])
    q = matmul(h1, layer['w_q'], layer['b_q'])   # (B*S, D), lane-dense
    k = matmul(h1, layer['w_k'], layer['b_k'])
    v = matmul(h1, layer['w_v'], layer['b_v'])

    # wrapper-side layout plumbing: (B*S, D) -> (B*H, S, Dh), head-major
    def to_heads(t):
        return t.reshape(B, S, H, Dh).transpose(0, 2, 1, 3).reshape(B * H, S, Dh)

    a = attention(to_heads(q), to_heads(k), to_heads(v), bias)
    a = a.reshape(B, H, S, Dh).transpose(0, 2, 1, 3).reshape(M, D)  # merge_heads

    x2d = matmul(a, layer['w_proj'], layer['b_proj'], residual=x2d)  # + residual 1

    # ---- ln_2 + MLP ----
    h2 = layer_norm(x2d, layer['ln2_g'], layer['ln2_b'])
    hf = matmul(h2, layer['w_fc'], layer['b_fc'], activation="gelu")
    x2d = matmul(hf, layer['w_proj2'], layer['b_proj2'], residual=x2d)  # + residual 2

    # present = stack((key.transpose(-2,-1), value)) -> (2, B, H, S, Dh)
    kh = k.reshape(B, S, H, Dh).transpose(0, 2, 1, 3)
    vh = v.reshape(B, S, H, Dh).transpose(0, 2, 1, 3)
    present = jnp.stack([kh, vh], axis=0)
    return x2d, present


def init_params(key, vocab_size, n_positions, n_embd, n_layer):
    D = n_embd
    keys = jax.random.split(key, 2 + 4 * n_layer)
    params = {
        'wte': 0.02 * jax.random.normal(keys[0], (vocab_size, D), jnp.float32),
        'wpe': 0.02 * jax.random.normal(keys[1], (n_positions, D), jnp.float32),
        'ln_f_g': jnp.ones((1, D), jnp.float32),
        'ln_f_b': jnp.zeros((1, D), jnp.float32),
        'layers': [],
    }
    for i in range(n_layer):
        k0, k1, k2, k3 = keys[2 + 4 * i: 2 + 4 * i + 4]
        w_attn = 0.02 * jax.random.normal(k0, (D, 3 * D), jnp.float32)
        params['layers'].append({
            'ln1_g': jnp.ones((1, D), jnp.float32),
            'ln1_b': jnp.zeros((1, D), jnp.float32),
            # c_attn (D, 3D) split into Q/K/V GEMMs (no in-kernel lane slicing);
            # weights stored bf16 for the MXU, biases/LN params stay fp32.
            'w_q': w_attn[:, 0 * D:1 * D].astype(jnp.bfloat16),
            'w_k': w_attn[:, 1 * D:2 * D].astype(jnp.bfloat16),
            'w_v': w_attn[:, 2 * D:3 * D].astype(jnp.bfloat16),
            'b_q': jnp.zeros((1, D), jnp.float32),
            'b_k': jnp.zeros((1, D), jnp.float32),
            'b_v': jnp.zeros((1, D), jnp.float32),
            'w_proj': (0.02 * jax.random.normal(k1, (D, D))).astype(jnp.bfloat16),
            'b_proj': jnp.zeros((1, D), jnp.float32),
            'ln2_g': jnp.ones((1, D), jnp.float32),
            'ln2_b': jnp.zeros((1, D), jnp.float32),
            'w_fc': (0.02 * jax.random.normal(k2, (D, 4 * D))).astype(jnp.bfloat16),
            'b_fc': jnp.zeros((1, 4 * D), jnp.float32),
            'w_proj2': (0.02 * jax.random.normal(k3, (4 * D, D))).astype(jnp.bfloat16),
            'b_proj2': jnp.zeros((1, D), jnp.float32),
        })
    return params


def gpt2_forward(params, input_ids, mask, n_head):
    """GPT2Model.forward with past=None, position_ids=None, causal `mask`."""
    B, S = input_ids.shape
    D = params['wte'].shape[1]
    pos = jnp.arange(S, dtype=jnp.int32)
    # embedding gathers are plain-JAX glue (outside the kernels)
    h = params['wte'][input_ids] + params['wpe'][pos][None, :, :]
    h = h.reshape(B * S, D)                 # embd dropout is identity (inference)

    # masked_fill(1 - mask, -10000) as an additive bias, computed once.
    bias = jnp.where(mask != 0, 0.0, -10000.0).astype(jnp.float32)

    # TODO(synk): cross-pallas_call weight prefetch (P10) so layer i+1 weights
    # stream while layer i computes.
    presents = []
    for layer in params['layers']:
        h, present = transformer_block(h, bias, layer, n_head, B, S)
        presents.append(present)

    h = layer_norm(h, params['ln_f_g'], params['ln_f_b'])
    return h.reshape(B, S, D), presents


# ----------------------------------- main ------------------------------------

if __name__ == "__main__":
    # small, self-consistent config
    vocab_size, n_positions, n_embd, n_head, n_layer = 256, 64, 128, 4, 2
    B, S = 2, 8

    key = jax.random.PRNGKey(0)
    pkey, ikey = jax.random.split(key)
    params = init_params(pkey, vocab_size, n_positions, n_embd, n_layer)

    input_ids = jax.random.randint(ikey, (B, S), 0, vocab_size, dtype=jnp.int32)
    mask = jnp.tril(jnp.ones((S, S), dtype=jnp.int32))   # causal: 1 = attend

    forward = jax.jit(gpt2_forward, static_argnums=(3,))
    hidden, presents = forward(params, input_ids, mask, n_head)
    hidden = jax.block_until_ready(hidden)
    presents = [jax.block_until_ready(p) for p in presents]

    assert hidden.shape == (B, S, n_embd)
    assert all(p.shape == (2, B, n_head, S, n_embd // n_head) for p in presents)
    assert bool(jnp.all(jnp.isfinite(hidden)))
    print("KERNEL_OK")
</pallas_src>

<mosaic_0001>
module attributes {stable_mosaic.version = 11 : i64} {
  func.func @_ln_kernel(%arg0: i32, %arg1: memref<16x128xf32, #tpu.memory_space<vmem>>, %arg2: memref<1x128xf32, #tpu.memory_space<vmem>>, %arg3: memref<1x128xf32, #tpu.memory_space<vmem>>, %arg4: memref<16x128xf32, #tpu.memory_space<vmem>>) attributes {dimension_semantics = [#tpu.dimension_semantics<parallel>], iteration_bounds = array<i64: 1>, scalar_prefetch = 0 : i64, scratch_operands = 0 : i64, tpu.core_type = #tpu.core_type<tc>, window_params = [{transform_indices = @transform_0, window_bounds = array<i64: 16, 128>}, {pipeline_mode = #tpu.pipeline_mode<synchronous>, transform_indices = @transform_1, window_bounds = array<i64: 1, 128>}, {pipeline_mode = #tpu.pipeline_mode<synchronous>, transform_indices = @transform_2, window_bounds = array<i64: 1, 128>}, {transform_indices = @transform_3, window_bounds = array<i64: 16, 128>}]} {
    %c0 = arith.constant 0 : index
    %c0_0 = arith.constant 0 : index
    %0 = vector.load %arg1[%c0, %c0_0] : memref<16x128xf32, #tpu.memory_space<vmem>>, vector<16x128xf32>
    %cst = arith.constant dense<0.000000e+00> : vector<16xf32>
    %1 = vector.multi_reduction <add>, %0, %cst [1] : vector<16x128xf32> to vector<16xf32>
    %2 = vector.shape_cast %1 : vector<16xf32> to vector<16x1xf32>
    %cst_1 = arith.constant 1.280000e+02 : f32
    %3 = vector.broadcast %cst_1 : f32 to vector<16x1xf32>
    %4 = arith.divf %2, %3 : vector<16x1xf32>
    %5 = vector.broadcast %4 : vector<16x1xf32> to vector<16x128xf32>
    %6 = arith.subf %0, %5 : vector<16x128xf32>
    %7 = arith.mulf %6, %6 : vector<16x128xf32>
    %cst_2 = arith.constant dense<0.000000e+00> : vector<16xf32>
    %8 = vector.multi_reduction <add>, %7, %cst_2 [1] : vector<16x128xf32> to vector<16xf32>
    %9 = vector.shape_cast %8 : vector<16xf32> to vector<16x1xf32>
    %cst_3 = arith.constant 1.280000e+02 : f32
    %10 = vector.broadcast %cst_3 : f32 to vector<16x1xf32>
    %11 = arith.divf %9, %10 : vector<16x1xf32>
    %12 = vector.broadcast %4 : vector<16x1xf32> to vector<16x128xf32>
    %13 = arith.subf %0, %12 : vector<16x128xf32>
    %cst_4 = arith.constant 9.99999974E-6 : f32
    %14 = vector.broadcast %cst_4 : f32 to vector<16x1xf32>
    %15 = arith.addf %11, %14 : vector<16x1xf32>
    %16 = math.rsqrt %15 : vector<16x1xf32>
    %17 = vector.broadcast %16 : vector<16x1xf32> to vector<16x128xf32>
    %18 = arith.mulf %13, %17 : vector<16x128xf32>
    %c0_5 = arith.constant 0 : index
    %c0_6 = arith.constant 0 : index
    %19 = vector.load %arg2[%c0_5, %c0_6] : memref<1x128xf32, #tpu.memory_space<vmem>>, vector<1x128xf32>
    %20 = vector.broadcast %19 : vector<1x128xf32> to vector<16x128xf32>
    %21 = arith.mulf %18, %20 : vector<16x128xf32>
    %c0_7 = arith.constant 0 : index
    %c0_8 = arith.constant 0 : index
    %22 = vector.load %arg3[%c0_7, %c0_8] : memref<1x128xf32, #tpu.memory_space<vmem>>, vector<1x128xf32>
    %23 = vector.broadcast %22 : vector<1x128xf32> to vector<16x128xf32>
    %24 = arith.addf %21, %23 : vector<16x128xf32>
    %c0_9 = arith.constant 0 : index
    %c0_10 = arith.constant 0 : index
    %25 = vector.load %arg4[%c0_9, %c0_10] : memref<16x128xf32, #tpu.memory_space<vmem>>, vector<16x128xf32>
    tpu.vector_store %arg4[%c0_9, %c0_10], %24 {strides = array<i32>} : memref<16x128xf32, #tpu.memory_space<vmem>>, vector<16x128xf32>,
    return
  }
  func.func @transform_0(%arg0: i32) -> (i32, i32) {
    %c0_i32 = arith.constant 0 : i32
    %c0_i32_0 = arith.constant 0 : i32
    return %arg0, %c0_i32 : i32, i32
  }
  func.func @transform_1(%arg0: i32) -> (i32, i32) {
    %c0_i32 = arith.constant 0 : i32
    %c0_i32_0 = arith.constant 0 : i32
    %c0_i32_1 = arith.constant 0 : i32
    return %c0_i32, %c0_i32_0 : i32, i32
  }
  func.func @transform_2(%arg0: i32) -> (i32, i32) {
    %c0_i32 = arith.constant 0 : i32
    %c0_i32_0 = arith.constant 0 : i32
    %c0_i32_1 = arith.constant 0 : i32
    return %c0_i32, %c0_i32_0 : i32, i32
  }
  func.func @transform_3(%arg0: i32) -> (i32, i32) {
    %c0_i32 = arith.constant 0 : i32
    %c0_i32_0 = arith.constant 0 : i32
    return %arg0, %c0_i32 : i32, i32
  }
}

module attributes {stable_mosaic.version = 11 : i64} {
  func.func @_matmul_kernel(%arg0: i32, %arg1: i32, %arg2: i32, %arg3: memref<16x128xf32, #tpu.memory_space<vmem>>, %arg4: memref<128x128xbf16, #tpu.memory_space<vmem>>, %arg5: memref<1x128xf32, #tpu.memory_space<vmem>>, %arg6: memref<16x128xf32, #tpu.memory_space<vmem>>, %arg7: memref<16x128xf32, #tpu.memory_space<vmem>>) attributes {dimension_semantics = [#tpu.dimension_semantics<parallel>, #tpu.dimension_semantics<parallel>, #tpu.dimension_semantics<arbitrary>], iteration_bounds = array<i64: 1, 1, 1>, scalar_prefetch = 0 : i64, scratch_operands = 1 : i64, tpu.core_type = #tpu.core_type<tc>, window_params = [{transform_indices = @transform_0, window_bounds = array<i64: 16, 128>}, {transform_indices = @transform_1, window_bounds = array<i64: 128, 128>}, {transform_indices = @transform_2, window_bounds = array<i64: 1, 128>}, {transform_indices = @transform_3, window_bounds = array<i64: 16, 128>}]} {
    %c0_i32 = arith.constant 0 : i32
    %0 = arith.cmpi eq, %arg2, %c0_i32 : i32
    %1 = arith.extui %0 : i1 to i32
    %c0_i32_0 = arith.constant 0 : i32
    %2 = arith.cmpi ne, %1, %c0_i32_0 : i32
    scf.if %2 {
      %cst_10 = arith.constant 0.000000e+00 : f32
      %13 = vector.broadcast %cst_10 : f32 to vector<16x128xf32>
      %c0_11 = arith.constant 0 : index
      %c0_12 = arith.constant 0 : index
      %14 = vector.load %arg7[%c0_11, %c0_12] : memref<16x128xf32, #tpu.memory_space<vmem>>, vector<16x128xf32>
      tpu.vector_store %arg7[%c0_11, %c0_12], %13 {strides = array<i32>} : memref<16x128xf32, #tpu.memory_space<vmem>>, vector<16x128xf32>,
    } else {
    }
    %c0 = arith.constant 0 : index
    %c0_1 = arith.constant 0 : index
    %3 = vector.load %arg7[%c0, %c0_1] : memref<16x128xf32, #tpu.memory_space<vmem>>, vector<16x128xf32>
    %c0_2 = arith.constant 0 : index
    %c0_3 = arith.constant 0 : index
    %4 = vector.load %arg3[%c0_2, %c0_3] : memref<16x128xf32, #tpu.memory_space<vmem>>, vector<16x128xf32>
    %5 = arith.truncf %4 : vector<16x128xf32> to vector<16x128xbf16>
    %c0_4 = arith.constant 0 : index
    %c0_5 = arith.constant 0 : index
    %6 = vector.load %arg4[%c0_4, %c0_5] : memref<128x128xbf16, #tpu.memory_space<vmem>>, vector<128x128xbf16>
    %cst = arith.constant dense<0.000000e+00> : vector<16x128xf32>
    %7 = tpu.matmul %5, %6, %cst {dimension_numbers = #tpu.dot_dimension_numbers<[1], [0], [0], [1], [0, 0, 1, 1], [], []>} : vector<16x128xbf16>, vector<128x128xbf16>, vector<16x128xf32> -> vector<16x128xf32>
    %8 = arith.addf %3, %7 : vector<16x128xf32>
    %c0_6 = arith.constant 0 : index
    %c0_7 = arith.constant 0 : index
    %9 = vector.load %arg7[%c0_6, %c0_7] : memref<16x128xf32, #tpu.memory_space<vmem>>, vector<16x128xf32>
    tpu.vector_store %arg7[%c0_6, %c0_7], %8 {strides = array<i32>} : memref<16x128xf32, #tpu.memory_space<vmem>>, vector<16x128xf32>,
    %c0_i32_8 = arith.constant 0 : i32
    %10 = arith.cmpi eq, %arg2, %c0_i32_8 : i32
    %11 = arith.extui %10 : i1 to i32
    %c0_i32_9 = arith.constant 0 : i32
    %12 = arith.cmpi ne, %11, %c0_i32_9 : i32
    scf.if %12 {
      %c0_10 = arith.constant 0 : index
      %c0_11 = arith.constant 0 : index
      %13 = vector.load %arg7[%c0_10, %c0_11] : memref<16x128xf32, #tpu.memory_space<vmem>>, vector<16x128xf32>
      %c0_12 = arith.constant 0 : index
      %c0_13 = arith.constant 0 : index
      %14 = vector.load %arg5[%c0_12, %c0_13] : memref<1x128xf32, #tpu.memory_space<vmem>>, vector<1x128xf32>
      %15 = vector.broadcast %14 : vector<1x128xf32> to vector<16x128xf32>
      %16 = arith.addf %13, %15 : vector<16x128xf32>
      %c0_14 = arith.constant 0 : index
      %c0_15 = arith.constant 0 : index
      %17 = vector.load %arg6[%c0_14, %c0_15] : memref<16x128xf32, #tpu.memory_space<vmem>>, vector<16x128xf32>
      tpu.vector_store %arg6[%c0_14, %c0_15], %16 {strides = array<i32>} : memref<16x128xf32, #tpu.memory_space<vmem>>, vector<16x128xf32>,
    } else {
    }
    return
  }
  func.func @transform_0(%arg0: i32, %arg1: i32, %arg2: i32) -> (i32, i32) {
    %c0_i32 = arith.constant 0 : i32
    return %arg0, %arg2 : i32, i32
  }
  func.func @transform_1(%arg0: i32, %arg1: i32, %arg2: i32) -> (i32, i32) {
    %c0_i32 = arith.constant 0 : i32
    return %arg2, %arg1 : i32, i32
  }
  func.func @transform_2(%arg0: i32, %arg1: i32, %arg2: i32) -> (i32, i32) {
    %c0_i32 = arith.constant 0 : i32
    %c0_i32_0 = arith.constant 0 : i32
    return %c0_i32, %arg1 : i32, i32
  }
  func.func @transform_3(%arg0: i32, %arg1: i32, %arg2: i32) -> (i32, i32) {
    %c0_i32 = arith.constant 0 : i32
    return %arg0, %arg1 : i32, i32
  }
}

module attributes {stable_mosaic.version = 11 : i64} {
  func.func @_attn_kernel(%arg0: i32, %arg1: i32, %arg2: memref<1x8x32xf32, #tpu.memory_space<vmem>>, %arg3: memref<1x8x32xf32, #tpu.memory_space<vmem>>, %arg4: memref<1x8x32xf32, #tpu.memory_space<vmem>>, %arg5: memref<8x8xf32, #tpu.memory_space<vmem>>, %arg6: memref<1x8x32xf32, #tpu.memory_space<vmem>>) attributes {dimension_semantics = [#tpu.dimension_semantics<parallel>, #tpu.dimension_semantics<parallel>], iteration_bounds = array<i64: 8, 1>, scalar_prefetch = 0 : i64, scratch_operands = 0 : i64, tpu.core_type = #tpu.core_type<tc>, window_params = [{transform_indices = @transform_0, window_bounds = array<i64: 1, 8, 32>}, {transform_indices = @transform_1, window_bounds = array<i64: 1, 8, 32>}, {transform_indices = @transform_2, window_bounds = array<i64: 1, 8, 32>}, {transform_indices = @transform_3, window_bounds = array<i64: 8, 8>}, {transform_indices = @transform_4, window_bounds = array<i64: 1, 8, 32>}]} {
    %c0 = arith.constant 0 : index
    %c0_0 = arith.constant 0 : index
    %c0_1 = arith.constant 0 : index
    %0 = vector.load %arg2[%c0, %c0_0, %c0_1] : memref<1x8x32xf32, #tpu.memory_space<vmem>>, vector<1x8x32xf32>
    %1 = vector.shape_cast %0 : vector<1x8x32xf32> to vector<8x32xf32>
    %2 = arith.truncf %1 : vector<8x32xf32> to vector<8x32xbf16>
    %c0_2 = arith.constant 0 : index
    %c0_3 = arith.constant 0 : index
    %c0_4 = arith.constant 0 : index
    %3 = vector.load %arg3[%c0_2, %c0_3, %c0_4] : memref<1x8x32xf32, #tpu.memory_space<vmem>>, vector<1x8x32xf32>
    %4 = vector.shape_cast %3 : vector<1x8x32xf32> to vector<8x32xf32>
    %5 = arith.truncf %4 : vector<8x32xf32> to vector<8x32xbf16>
    %c0_5 = arith.constant 0 : index
    %c0_6 = arith.constant 0 : index
    %c0_7 = arith.constant 0 : index
    %6 = vector.load %arg4[%c0_5, %c0_6, %c0_7] : memref<1x8x32xf32, #tpu.memory_space<vmem>>, vector<1x8x32xf32>
    %7 = vector.shape_cast %6 : vector<1x8x32xf32> to vector<8x32xf32>
    %8 = arith.truncf %7 : vector<8x32xf32> to vector<8x32xbf16>
    %cst = arith.constant dense<0.000000e+00> : vector<8x8xf32>
    %9 = tpu.matmul %2, %5, %cst {dimension_numbers = #tpu.dot_dimension_numbers<[1], [1], [0], [0], [0, 0, 1, 0], [], []>} : vector<8x32xbf16>, vector<8x32xbf16>, vector<8x8xf32> -> vector<8x8xf32>
    %cst_8 = arith.constant 0.176776692 : f32
    %10 = vector.broadcast %cst_8 : f32 to vector<8x8xf32>
    %11 = arith.mulf %9, %10 : vector<8x8xf32>
    %c0_9 = arith.constant 0 : index
    %c0_10 = arith.constant 0 : index
    %12 = vector.load %arg5[%c0_9, %c0_10] : memref<8x8xf32, #tpu.memory_space<vmem>>, vector<8x8xf32>
    %13 = arith.addf %11, %12 : vector<8x8xf32>
    %cst_11 = arith.constant dense<0xFF800000> : vector<8xf32>
    %14 = vector.multi_reduction <maximumf>, %13, %cst_11 [1] : vector<8x8xf32> to vector<8xf32>
    %15 = vector.shape_cast %14 : vector<8xf32> to vector<8x1xf32>
    %16 = vector.broadcast %15 : vector<8x1xf32> to vector<8x8xf32>
    %17 = arith.subf %13, %16 : vector<8x8xf32>
    %18 = math.exp %17 : vector<8x8xf32>
    %cst_12 = arith.constant dense<0.000000e+00> : vector<8xf32>
    %19 = vector.multi_reduction <add>, %18, %cst_12 [1] : vector<8x8xf32> to vector<8xf32>
    %20 = vector.shape_cast %19 : vector<8xf32> to vector<8x1xf32>
    %21 = tpu.reciprocal %20 {approx = true} : vector<8x1xf32> -> vector<8x1xf32>
    %22 = vector.broadcast %21 : vector<8x1xf32> to vector<8x8xf32>
    %23 = arith.mulf %18, %22 : vector<8x8xf32>
    %24 = arith.truncf %23 : vector<8x8xf32> to vector<8x8xbf16>
    %cst_13 = arith.constant dense<0.000000e+00> : vector<8x32xf32>
    %25 = tpu.matmul %24, %8, %cst_13 {dimension_numbers = #tpu.dot_dimension_numbers<[1], [0], [0], [1], [0, 0, 1, 1], [], []>} : vector<8x8xbf16>, vector<8x32xbf16>, vector<8x32xf32> -> vector<8x32xf32>
    %c0_14 = arith.constant 0 : index
    %c0_15 = arith.constant 0 : index
    %c0_16 = arith.constant 0 : index
    %26 = vector.load %arg6[%c0_14, %c0_15, %c0_16] : memref<1x8x32xf32, #tpu.memory_space<vmem>>, vector<1x8x32xf32>
    %27 = vector.shape_cast %26 : vector<1x8x32xf32> to vector<8x32xf32>
    %28 = vector.shape_cast %25 : vector<8x32xf32> to vector<1x8x32xf32>
    tpu.vector_store %arg6[%c0_14, %c0_15, %c0_16], %28 {strides = array<i32>} : memref<1x8x32xf32, #tpu.memory_space<vmem>>, vector<1x8x32xf32>,
    return
  }
  func.func @transform_0(%arg0: i32, %arg1: i32) -> (i32, i32, i32) {
    %c0_i32 = arith.constant 0 : i32
    %c0_i32_0 = arith.constant 0 : i32
    return %arg0, %arg1, %c0_i32 : i32, i32, i32
  }
  func.func @transform_1(%arg0: i32, %arg1: i32) -> (i32, i32, i32) {
    %c0_i32 = arith.constant 0 : i32
    %c0_i32_0 = arith.constant 0 : i32
    %c0_i32_1 = arith.constant 0 : i32
    return %arg0, %c0_i32, %c0_i32_0 : i32, i32, i32
  }
  func.func @transform_2(%arg0: i32, %arg1: i32) -> (i32, i32, i32) {
    %c0_i32 = arith.constant 0 : i32
    %c0_i32_0 = arith.constant 0 : i32
    %c0_i32_1 = arith.constant 0 : i32
    return %arg0, %c0_i32, %c0_i32_0 : i32, i32, i32
  }
  func.func @transform_3(%arg0: i32, %arg1: i32) -> (i32, i32) {
    %c0_i32 = arith.constant 0 : i32
    %c0_i32_0 = arith.constant 0 : i32
    return %arg1, %c0_i32 : i32, i32
  }
  func.func @transform_4(%arg0: i32, %arg1: i32) -> (i32, i32, i32) {
    %c0_i32 = arith.constant 0 : i32
    %c0_i32_0 = arith.constant 0 : i32
    return %arg0, %arg1, %c0_i32 : i32, i32, i32
  }
}

module attributes {stable_mosaic.version = 11 : i64} {
  func.func @_matmul_kernel(%arg0: i32, %arg1: i32, %arg2: i32, %arg3: memref<16x128xf32, #tpu.memory_space<vmem>>, %arg4: memref<128x128xbf16, #tpu.memory_space<vmem>>, %arg5: memref<1x128xf32, #tpu.memory_space<vmem>>, %arg6: memref<16x128xf32, #tpu.memory_space<vmem>>, %arg7: memref<16x128xf32, #tpu.memory_space<vmem>>, %arg8: memref<16x128xf32, #tpu.memory_space<vmem>>) attributes {dimension_semantics = [#tpu.dimension_semantics<parallel>, #tpu.dimension_semantics<parallel>, #tpu.dimension_semantics<arbitrary>], iteration_bounds = array<i64: 1, 1, 1>, scalar_prefetch = 0 : i64, scratch_operands = 1 : i64, tpu.core_type = #tpu.core_type<tc>, window_params = [{transform_indices = @transform_0, window_bounds = array<i64: 16, 128>}, {transform_indices = @transform_1, window_bounds = array<i64: 128, 128>}, {transform_indices = @transform_2, window_bounds = array<i64: 1, 128>}, {transform_indices = @transform_3, window_bounds = array<i64: 16, 128>}, {transform_indices = @transform_4, window_bounds = array<i64: 16, 128>}]} {
    %c0_i32 = arith.constant 0 : i32
    %0 = arith.cmpi eq, %arg2, %c0_i32 : i32
    %1 = arith.extui %0 : i1 to i32
    %c0_i32_0 = arith.constant 0 : i32
    %2 = arith.cmpi ne, %1, %c0_i32_0 : i32
    scf.if %2 {
      %cst_10 = arith.constant 0.000000e+00 : f32
      %13 = vector.broadcast %cst_10 : f32 to vector<16x128xf32>
      %c0_11 = arith.constant 0 : index
      %c0_12 = arith.constant 0 : index
      %14 = vector.load %arg8[%c0_11, %c0_12] : memref<16x128xf32, #tpu.memory_space<vmem>>, vector<16x128xf32>
      tpu.vector_store %arg8[%c0_11, %c0_12], %13 {strides = array<i32>} : memref<16x128xf32, #tpu.memory_space<vmem>>, vector<16x128xf32>,
    } else {
    }
    %c0 = arith.constant 0 : index
    %c0_1 = arith.constant 0 : index
    %3 = vector.load %arg8[%c0, %c0_1] : memref<16x128xf32, #tpu.memory_space<vmem>>, vector<16x128xf32>
    %c0_2 = arith.constant 0 : index
    %c0_3 = arith.constant 0 : index
    %4 = vector.load %arg3[%c0_2, %c0_3] : memref<16x128xf32, #tpu.memory_space<vmem>>, vector<16x128xf32>
    %5 = arith.truncf %4 : vector<16x128xf32> to vector<16x128xbf16>
    %c0_4 = arith.constant 0 : index
    %c0_5 = arith.constant 0 : index
    %6 = vector.load %arg4[%c0_4, %c0_5] : memref<128x128xbf16, #tpu.memory_space<vmem>>, vector<128x128xbf16>
    %cst = arith.constant dense<0.000000e+00> : vector<16x128xf32>
    %7 = tpu.matmul %5, %6, %cst {dimension_numbers = #tpu.dot_dimension_numbers<[1], [0], [0], [1], [0, 0, 1, 1], [], []>} : vector<16x128xbf16>, vector<128x128xbf16>, vector<16x128xf32> -> vector<16x128xf32>
    %8 = arith.addf %3, %7 : vector<16x128xf32>
    %c0_6 = arith.constant 0 : index
    %c0_7 = arith.constant 0 : index
    %9 = vector.load %arg8[%c0_6, %c0_7] : memref<16x128xf32, #tpu.memory_space<vmem>>, vector<16x128xf32>
    tpu.vector_store %arg8[%c0_6, %c0_7], %8 {strides = array<i32>} : memref<16x128xf32, #tpu.memory_space<vmem>>, vector<16x128xf32>,
    %c0_i32_8 = arith.constant 0 : i32
    %10 = arith.cmpi eq, %arg2, %c0_i32_8 : i32
    %11 = arith.extui %10 : i1 to i32
    %c0_i32_9 = arith.constant 0 : i32
    %12 = arith.cmpi ne, %11, %c0_i32_9 : i32
    scf.if %12 {
      %c0_10 = arith.constant 0 : index
      %c0_11 = arith.constant 0 : index
      %13 = vector.load %arg8[%c0_10, %c0_11] : memref<16x128xf32, #tpu.memory_space<vmem>>, vector<16x128xf32>
      %c0_12 = arith.constant 0 : index
      %c0_13 = arith.constant 0 : index
      %14 = vector.load %arg5[%c0_12, %c0_13] : memref<1x128xf32, #tpu.memory_space<vmem>>, vector<1x128xf32>
      %15 = vector.broadcast %14 : vector<1x128xf32> to vector<16x128xf32>
      %16 = arith.addf %13, %15 : vector<16x128xf32>
      %c0_14 = arith.constant 0 : index
      %c0_15 = arith.constant 0 : index
      %17 = vector.load %arg6[%c0_14, %c0_15] : memref<16x128xf32, #tpu.memory_space<vmem>>, vector<16x128xf32>
      %18 = arith.addf %16, %17 : vector<16x128xf32>
      %c0_16 = arith.constant 0 : index
      %c0_17 = arith.constant 0 : index
      %19 = vector.load %arg7[%c0_16, %c0_17] : memref<16x128xf32, #tpu.memory_space<vmem>>, vector<16x128xf32>
      tpu.vector_store %arg7[%c0_16, %c0_17], %18 {strides = array<i32>} : memref<16x128xf32, #tpu.memory_space<vmem>>, vector<16x128xf32>,
    } else {
    }
    return
  }
  func.func @transform_0(%arg0: i32, %arg1: i32, %arg2: i32) -> (i32, i32) {
    %c0_i32 = arith.constant 0 : i32
    return %arg0, %arg2 : i32, i32
  }
  func.func @transform_1(%arg0: i32, %arg1: i32, %arg2: i32) -> (i32, i32) {
    %c0_i32 = arith.constant 0 : i32
    return %arg2, %arg1 : i32, i32
  }
  func.func @transform_2(%arg0: i32, %arg1: i32, %arg2: i32) -> (i32, i32) {
    %c0_i32 = arith.constant 0 : i32
    %c0_i32_0 = arith.constant 0 : i32
    return %c0_i32, %arg1 : i32, i32
  }
  func.func @transform_3(%arg0: i32, %arg1: i32, %arg2: i32) -> (i32, i32) {
    %c0_i32 = arith.constant 0 : i32
    return %arg0, %arg1 : i32, i32
  }
  func.func @transform_4(%arg0: i32, %arg1: i32, %arg2: i32) -> (i32, i32) {
    %c0_i32 = arith.constant 0 : i32
    return %arg0, %arg1 : i32, i32
  }
}

module attributes {stable_mosaic.version = 11 : i64} {
  func.func @_matmul_kernel(%arg0: i32, %arg1: i32, %arg2: i32, %arg3: memref<16x128xf32, #tpu.memory_space<vmem>>, %arg4: memref<128x256xbf16, #tpu.memory_space<vmem>>, %arg5: memref<1x256xf32, #tpu.memory_space<vmem>>, %arg6: memref<16x256xf32, #tpu.memory_space<vmem>>, %arg7: memref<16x256xf32, #tpu.memory_space<vmem>>) attributes {dimension_semantics = [#tpu.dimension_semantics<parallel>, #tpu.dimension_semantics<parallel>, #tpu.dimension_semantics<arbitrary>], iteration_bounds = array<i64: 1, 2, 1>, scalar_prefetch = 0 : i64, scratch_operands = 1 : i64, tpu.core_type = #tpu.core_type<tc>, window_params = [{transform_indices = @transform_0, window_bounds = array<i64: 16, 128>}, {transform_indices = @transform_1, window_bounds = array<i64: 128, 256>}, {transform_indices = @transform_2, window_bounds = array<i64: 1, 256>}, {transform_indices = @transform_3, window_bounds = array<i64: 16, 256>}]} {
    %c0_i32 = arith.constant 0 : i32
    %0 = arith.cmpi eq, %arg2, %c0_i32 : i32
    %1 = arith.extui %0 : i1 to i32
    %c0_i32_0 = arith.constant 0 : i32
    %2 = arith.cmpi ne, %1, %c0_i32_0 : i32
    scf.if %2 {
      %cst_10 = arith.constant 0.000000e+00 : f32
      %13 = vector.broadcast %cst_10 : f32 to vector<16x256xf32>
      %c0_11 = arith.constant 0 : index
      %c0_12 = arith.constant 0 : index
      %14 = vector.load %arg7[%c0_11, %c0_12] : memref<16x256xf32, #tpu.memory_space<vmem>>, vector<16x256xf32>
      tpu.vector_store %arg7[%c0_11, %c0_12], %13 {strides = array<i32>} : memref<16x256xf32, #tpu.memory_space<vmem>>, vector<16x256xf32>,
    } else {
    }
    %c0 = arith.constant 0 : index
    %c0_1 = arith.constant 0 : index
    %3 = vector.load %arg7[%c0, %c0_1] : memref<16x256xf32, #tpu.memory_space<vmem>>, vector<16x256xf32>
    %c0_2 = arith.constant 0 : index
    %c0_3 = arith.constant 0 : index
    %4 = vector.load %arg3[%c0_2, %c0_3] : memref<16x128xf32, #tpu.memory_space<vmem>>, vector<16x128xf32>
    %5 = arith.truncf %4 : vector<16x128xf32> to vector<16x128xbf16>
    %c0_4 = arith.constant 0 : index
    %c0_5 = arith.constant 0 : index
    %6 = vector.load %arg4[%c0_4, %c0_5] : memref<128x256xbf16, #tpu.memory_space<vmem>>, vector<128x256xbf16>
    %cst = arith.constant dense<0.000000e+00> : vector<16x256xf32>
    %7 = tpu.matmul %5, %6, %cst {dimension_numbers = #tpu.dot_dimension_numbers<[1], [0], [0], [1], [0, 0, 1, 1], [], []>} : vector<16x128xbf16>, vector<128x256xbf16>, vector<16x256xf32> -> vector<16x256xf32>
    %8 = arith.addf %3, %7 : vector<16x256xf32>
    %c0_6 = arith.constant 0 : index
    %c0_7 = arith.constant 0 : index
    %9 = vector.load %arg7[%c0_6, %c0_7] : memref<16x256xf32, #tpu.memory_space<vmem>>, vector<16x256xf32>
    tpu.vector_store %arg7[%c0_6, %c0_7], %8 {strides = array<i32>} : memref<16x256xf32, #tpu.memory_space<vmem>>, vector<16x256xf32>,
    %c0_i32_8 = arith.constant 0 : i32
    %10 = arith.cmpi eq, %arg2, %c0_i32_8 : i32
    %11 = arith.extui %10 : i1 to i32
    %c0_i32_9 = arith.constant 0 : i32
    %12 = arith.cmpi ne, %11, %c0_i32_9 : i32
    scf.if %12 {
      %c0_10 = arith.constant 0 : index
      %c0_11 = arith.constant 0 : index
      %13 = vector.load %arg7[%c0_10, %c0_11] : memref<16x256xf32, #tpu.memory_space<vmem>>, vector<16x256xf32>
      %c0_12 = arith.constant 0 : index
      %c0_13 = arith.constant 0 : index
      %14 = vector.load %arg5[%c0_12, %c0_13] : memref<1x256xf32, #tpu.memory_space<vmem>>, vector<1x256xf32>
      %15 = vector.broadcast %14 : vector<1x256xf32> to vector<16x256xf32>
      %16 = arith.addf %13, %15 : vector<16x256xf32>
      %cst_14 = arith.constant 5.000000e-01 : f32
      %17 = vector.broadcast %cst_14 : f32 to vector<16x256xf32>
      %18 = arith.mulf %17, %16 : vector<16x256xf32>
      %cst_15 = arith.constant 4.471500e-02 : f32
      %19 = vector.broadcast %cst_15 : f32 to vector<16x256xf32>
      %20 = arith.mulf %19, %16 : vector<16x256xf32>
      %21 = arith.mulf %20, %16 : vector<16x256xf32>
      %22 = arith.mulf %21, %16 : vector<16x256xf32>
      %23 = arith.addf %16, %22 : vector<16x256xf32>
      %cst_16 = arith.constant 0.797884583 : f32
      %24 = vector.broadcast %cst_16 : f32 to vector<16x256xf32>
      %25 = arith.mulf %24, %23 : vector<16x256xf32>
      %26 = math.tanh %25 : vector<16x256xf32>
      %cst_17 = arith.constant 1.000000e+00 : f32
      %27 = vector.broadcast %cst_17 : f32 to vector<16x256xf32>
      %28 = arith.addf %27, %26 : vector<16x256xf32>
      %29 = arith.mulf %18, %28 : vector<16x256xf32>
      %c0_18 = arith.constant 0 : index
      %c0_19 = arith.constant 0 : index
      %30 = vector.load %arg6[%c0_18, %c0_19] : memref<16x256xf32, #tpu.memory_space<vmem>>, vector<16x256xf32>
      tpu.vector_store %arg6[%c0_18, %c0_19], %29 {strides = array<i32>} : memref<16x256xf32, #tpu.memory_space<vmem>>, vector<16x256xf32>,
    } else {
    }
    return
  }
  func.func @transform_0(%arg0: i32, %arg1: i32, %arg2: i32) -> (i32, i32) {
    %c0_i32 = arith.constant 0 : i32
    return %arg0, %arg2 : i32, i32
  }
  func.func @transform_1(%arg0: i32, %arg1: i32, %arg2: i32) -> (i32, i32) {
    %c0_i32 = arith.constant 0 : i32
    return %arg2, %arg1 : i32, i32
  }
  func.func @transform_2(%arg0: i32, %arg1: i32, %arg2: i32) -> (i32, i32) {
    %c0_i32 = arith.constant 0 : i32
    %c0_i32_0 = arith.constant 0 : i32
    return %c0_i32, %arg1 : i32, i32
  }
  func.func @transform_3(%arg0: i32, %arg1: i32, %arg2: i32) -> (i32, i32) {
    %c0_i32 = arith.constant 0 : i32
    return %arg0, %arg1 : i32, i32
  }
}

module attributes {stable_mosaic.version = 11 : i64} {
  func.func @_matmul_kernel(%arg0: i32, %arg1: i32, %arg2: i32, %arg3: memref<16x512xf32, #tpu.memory_space<vmem>>, %arg4: memref<512x128xbf16, #tpu.memory_space<vmem>>, %arg5: memref<1x128xf32, #tpu.memory_space<vmem>>, %arg6: memref<16x128xf32, #tpu.memory_space<vmem>>, %arg7: memref<16x128xf32, #tpu.memory_space<vmem>>, %arg8: memref<16x128xf32, #tpu.memory_space<vmem>>) attributes {dimension_semantics = [#tpu.dimension_semantics<parallel>, #tpu.dimension_semantics<parallel>, #tpu.dimension_semantics<arbitrary>], iteration_bounds = array<i64: 1, 1, 1>, scalar_prefetch = 0 : i64, scratch_operands = 1 : i64, tpu.core_type = #tpu.core_type<tc>, window_params = [{transform_indices = @transform_0, window_bounds = array<i64: 16, 512>}, {transform_indices = @transform_1, window_bounds = array<i64: 512, 128>}, {transform_indices = @transform_2, window_bounds = array<i64: 1, 128>}, {transform_indices = @transform_3, window_bounds = array<i64: 16, 128>}, {transform_indices = @transform_4, window_bounds = array<i64: 16, 128>}]} {
    %c0_i32 = arith.constant 0 : i32
    %0 = arith.cmpi eq, %arg2, %c0_i32 : i32
    %1 = arith.extui %0 : i1 to i32
    %c0_i32_0 = arith.constant 0 : i32
    %2 = arith.cmpi ne, %1, %c0_i32_0 : i32
    scf.if %2 {
      %cst_10 = arith.constant 0.000000e+00 : f32
      %13 = vector.broadcast %cst_10 : f32 to vector<16x128xf32>
      %c0_11 = arith.constant 0 : index
      %c0_12 = arith.constant 0 : index
      %14 = vector.load %arg8[%c0_11, %c0_12] : memref<16x128xf32, #tpu.memory_space<vmem>>, vector<16x128xf32>
      tpu.vector_store %arg8[%c0_11, %c0_12], %13 {strides = array<i32>} : memref<16x128xf32, #tpu.memory_space<vmem>>, vector<16x128xf32>,
    } else {
    }
    %c0 = arith.constant 0 : index
    %c0_1 = arith.constant 0 : index
    %3 = vector.load %arg8[%c0, %c0_1] : memref<16x128xf32, #tpu.memory_space<vmem>>, vector<16x128xf32>
    %c0_2 = arith.constant 0 : index
    %c0_3 = arith.constant 0 : index
    %4 = vector.load %arg3[%c0_2, %c0_3] : memref<16x512xf32, #tpu.memory_space<vmem>>, vector<16x512xf32>
    %5 = arith.truncf %4 : vector<16x512xf32> to vector<16x512xbf16>
    %c0_4 = arith.constant 0 : index
    %c0_5 = arith.constant 0 : index
    %6 = vector.load %arg4[%c0_4, %c0_5] : memref<512x128xbf16, #tpu.memory_space<vmem>>, vector<512x128xbf16>
    %cst = arith.constant dense<0.000000e+00> : vector<16x128xf32>
    %7 = tpu.matmul %5, %6, %cst {dimension_numbers = #tpu.dot_dimension_numbers<[1], [0], [0], [1], [0, 0, 1, 1], [], []>} : vector<16x512xbf16>, vector<512x128xbf16>, vector<16x128xf32> -> vector<16x128xf32>
    %8 = arith.addf %3, %7 : vector<16x128xf32>
    %c0_6 = arith.constant 0 : index
    %c0_7 = arith.constant 0 : index
    %9 = vector.load %arg8[%c0_6, %c0_7] : memref<16x128xf32, #tpu.memory_space<vmem>>, vector<16x128xf32>
    tpu.vector_store %arg8[%c0_6, %c0_7], %8 {strides = array<i32>} : memref<16x128xf32, #tpu.memory_space<vmem>>, vector<16x128xf32>,
    %c0_i32_8 = arith.constant 0 : i32
    %10 = arith.cmpi eq, %arg2, %c0_i32_8 : i32
    %11 = arith.extui %10 : i1 to i32
    %c0_i32_9 = arith.constant 0 : i32
    %12 = arith.cmpi ne, %11, %c0_i32_9 : i32
    scf.if %12 {
      %c0_10 = arith.constant 0 : index
      %c0_11 = arith.constant 0 : index
      %13 = vector.load %arg8[%c0_10, %c0_11] : memref<16x128xf32, #tpu.memory_space<vmem>>, vector<16x128xf32>
      %c0_12 = arith.constant 0 : index
      %c0_13 = arith.constant 0 : index
      %14 = vector.load %arg5[%c0_12, %c0_13] : memref<1x128xf32, #tpu.memory_space<vmem>>, vector<1x128xf32>
      %15 = vector.broadcast %14 : vector<1x128xf32> to vector<16x128xf32>
      %16 = arith.addf %13, %15 : vector<16x128xf32>
      %c0_14 = arith.constant 0 : index
      %c0_15 = arith.constant 0 : index
      %17 = vector.load %arg6[%c0_14, %c0_15] : memref<16x128xf32, #tpu.memory_space<vmem>>, vector<16x128xf32>
      %18 = arith.addf %16, %17 : vector<16x128xf32>
      %c0_16 = arith.constant 0 : index
      %c0_17 = arith.constant 0 : index
      %19 = vector.load %arg7[%c0_16, %c0_17] : memref<16x128xf32, #tpu.memory_space<vmem>>, vector<16x128xf32>
      tpu.vector_store %arg7[%c0_16, %c0_17], %18 {strides = array<i32>} : memref<16x128xf32, #tpu.memory_space<vmem>>, vector<16x128xf32>,
    } else {
    }
    return
  }
  func.func @transform_0(%arg0: i32, %arg1: i32, %arg2: i32) -> (i32, i32) {
    %c0_i32 = arith.constant 0 : i32
    return %arg0, %arg2 : i32, i32
  }
  func.func @transform_1(%arg0: i32, %arg1: i32, %arg2: i32) -> (i32, i32) {
    %c0_i32 = arith.constant 0 : i32
    return %arg2, %arg1 : i32, i32
  }
  func.func @transform_2(%arg0: i32, %arg1: i32, %arg2: i32) -> (i32, i32) {
    %c0_i32 = arith.constant 0 : i32
    %c0_i32_0 = arith.constant 0 : i32
    return %c0_i32, %arg1 : i32, i32
  }
  func.func @transform_3(%arg0: i32, %arg1: i32, %arg2: i32) -> (i32, i32) {
    %c0_i32 = arith.constant 0 : i32
    return %arg0, %arg1 : i32, i32
  }
  func.func @transform_4(%arg0: i32, %arg1: i32, %arg2: i32) -> (i32, i32) {
    %c0_i32 = arith.constant 0 : i32
    return %arg0, %arg1 : i32, i32
  }
}

module attributes {stable_mosaic.version = 11 : i64} {
  func.func @_ln_kernel(%arg0: i32, %arg1: memref<16x128xf32, #tpu.memory_space<vmem>>, %arg2: memref<1x128xf32, #tpu.memory_space<vmem>>, %arg3: memref<1x128xf32, #tpu.memory_space<vmem>>, %arg4: memref<16x128xf32, #tpu.memory_space<vmem>>) attributes {dimension_semantics = [#tpu.dimension_semantics<parallel>], iteration_bounds = array<i64: 1>, scalar_prefetch = 0 : i64, scratch_operands = 0 : i64, tpu.core_type = #tpu.core_type<tc>, window_params = [{transform_indices = @transform_0, window_bounds = array<i64: 16, 128>}, {pipeline_mode = #tpu.pipeline_mode<synchronous>, transform_indices = @transform_1, window_bounds = array<i64: 1, 128>}, {pipeline_mode = #tpu.pipeline_mode<synchronous>, transform_indices = @transform_2, window_bounds = array<i64: 1, 128>}, {transform_indices = @transform_3, window_bounds = array<i64: 16, 128>}]} {
    %c0 = arith.constant 0 : index
    %c0_0 = arith.constant 0 : index
    %0 = vector.load %arg1[%c0, %c0_0] : memref<16x128xf32, #tpu.memory_space<vmem>>, vector<16x128xf32>
    %cst = arith.constant dense<0.000000e+00> : vector<16xf32>
    %1 = vector.multi_reduction <add>, %0, %cst [1] : vector<16x128xf32> to vector<16xf32>
    %2 = vector.shape_cast %1 : vector<16xf32> to vector<16x1xf32>
    %cst_1 = arith.constant 1.280000e+02 : f32
    %3 = vector.broadcast %cst_1 : f32 to vector<16x1xf32>
    %4 = arith.divf %2, %3 : vector<16x1xf32>
    %5 = vector.broadcast %4 : vector<16x1xf32> to vector<16x128xf32>
    %6 = arith.subf %0, %5 : vector<16x128xf32>
    %7 = arith.mulf %6, %6 : vector<16x128xf32>
    %cst_2 = arith.constant dense<0.000000e+00> : vector<16xf32>
    %8 = vector.multi_reduction <add>, %7, %cst_2 [1] : vector<16x128xf32> to vector<16xf32>
    %9 = vector.shape_cast %8 : vector<16xf32> to vector<16x1xf32>
    %cst_3 = arith.constant 1.280000e+02 : f32
    %10 = vector.broadcast %cst_3 : f32 to vector<16x1xf32>
    %11 = arith.divf %9, %10 : vector<16x1xf32>
    %12 = vector.broadcast %4 : vector<16x1xf32> to vector<16x128xf32>
    %13 = arith.subf %0, %12 : vector<16x128xf32>
    %cst_4 = arith.constant 9.99999974E-6 : f32
    %14 = vector.broadcast %cst_4 : f32 to vector<16x1xf32>
    %15 = arith.addf %11, %14 : vector<16x1xf32>
    %16 = math.rsqrt %15 : vector<16x1xf32>
    %17 = vector.broadcast %16 : vector<16x1xf32> to vector<16x128xf32>
    %18 = arith.mulf %13, %17 : vector<16x128xf32>
    %c0_5 = arith.constant 0 : index
    %c0_6 = arith.constant 0 : index
    %19 = vector.load %arg2[%c0_5, %c0_6] : memref<1x128xf32, #tpu.memory_space<vmem>>, vector<1x128xf32>
    %20 = vector.broadcast %19 : vector<1x128xf32> to vector<16x128xf32>
    %21 = arith.mulf %18, %20 : vector<16x128xf32>
    %c0_7 = arith.constant 0 : index
    %c0_8 = arith.constant 0 : index
    %22 = vector.load %arg3[%c0_7, %c0_8] : memref<1x128xf32, #tpu.memory_space<vmem>>, vector<1x128xf32>
    %23 = vector.broadcast %22 : vector<1x128xf32> to vector<16x128xf32>
    %24 = arith.addf %21, %23 : vector<16x128xf32>
    %c0_9 = arith.constant 0 : index
    %c0_10 = arith.constant 0 : index
    %25 = vector.load %arg4[%c0_9, %c0_10] : memref<16x128xf32, #tpu.memory_space<vmem>>, vector<16x128xf32>
    tpu.vector_store %arg4[%c0_9, %c0_10], %24 {strides = array<i32>} : memref<16x128xf32, #tpu.memory_space<vmem>>, vector<16x128xf32>,
    return
  }
  func.func @transform_0(%arg0: i32) -> (i32, i32) {
    %c0_i32 = arith.constant 0 : i32
    %c0_i32_0 = arith.constant 0 : i32
    return %arg0, %c0_i32 : i32, i32
  }
  func.func @transform_1(%arg0: i32) -> (i32, i32) {
    %c0_i32 = arith.constant 0 : i32
    %c0_i32_0 = arith.constant 0 : i32
    %c0_i32_1 = arith.constant 0 : i32
    return %c0_i32, %c0_i32_0 : i32, i32
  }
  func.func @transform_2(%arg0: i32) -> (i32, i32) {
    %c0_i32 = arith.constant 0 : i32
    %c0_i32_0 = arith.constant 0 : i32
    %c0_i32_1 = arith.constant 0 : i32
    return %c0_i32, %c0_i32_0 : i32, i32
  }
  func.func @transform_3(%arg0: i32) -> (i32, i32) {
    %c0_i32 = arith.constant 0 : i32
    %c0_i32_0 = arith.constant 0 : i32
    return %arg0, %c0_i32 : i32, i32
  }
}

</mosaic_0001>

<bundles_post_ra>
// kernel: gpt2_forward.19
= control target key start
LH: loop header
LB: loop body
LE: loop exit
PB: predicated region body
PF: predicated region fallthrough
CT: control target
= control target key end

     0   :  { %v90_v2 = vmov 128.0   ;;  %s129_s0 = inlined_call_operand.vmem [shape: f32[16,128], index: 0, kind: input, shape index: {}]   ;;  %s130_s1 = inlined_call_operand.vmem [shape: f32[1,128], index: 1, kind: input, shape index: {}]   ;;  %s131_s2 = inlined_call_operand.vmem [shape: f32[1,128], index: 2, kind: input, shape index: {}]   ;;  %s132_s3 = inlined_call_operand.vmem [shape: f32[16,128], index: 3, kind: output, shape index: {}]  }
   0x1   :  { %v14_v0 = vld [vmem:[%s129_s0] sm:$0xff]  ;;  %v15_v1 = vld [vmem:[%s129_s0 + $0x8] sm:$0xff]  ;;  %84 = vrcp.f32 %v90_v2 }
   0x2   :  { %16 = vadd.xlane.f32.xlu0 %v14_v0  ;;  %v82_v31 = vld [vmem:[%s130_s1] ss:$0 sm:$0xff] }
   0x3   :  { %v83_v34 = vld [vmem:[%s131_s2] ss:$0 sm:$0xff] }
   0x7   :  { %v85_v3 = vpop.eup %84 }
   0x8   :  { %v21_v4 = vmul.f32 128.0, %v85_v3  ;;  %vm25_vm0 = vweird.f32 %v85_v3 }
   0xa   :  { %18 = vadd.xlane.f32.xlu0 %v15_v1  ;;  %v22_v5 = vsub.f32 1.0, %v21_v4 }
   0xc   :  { %v23_v6 = vmul.f32 %v85_v3, %v22_v5 }
   0xe   :  { %v24_v7 = vadd.f32 %v85_v3, %v23_v6 }
  0x10   :  { %v26_v8 = vsel %vm25_vm0, %v85_v3, %v24_v7 }
  0x75   :  { %v17_v9 = vpop.xlane.xlu0 %16 }
  0x76   :  { %v27_v10 = vmul.f32 %v26_v8, %v17_v9 }
  0x78   :  { %v29_v11 = vsub.f32 %v14_v0, %v27_v10 }
  0x7a   :  { %v31_v12 = vmul.f32 %v29_v11, %v29_v11 }
  0x7c   :  { %33 = vadd.xlane.f32.xlu1 %v31_v12 }
  0x7d   :  { %v19_v13 = vpop.xlane.xlu0 %18 }
  0x7e   :  { %v28_v14 = vmul.f32 %v26_v8, %v19_v13 }
  0x80   :  { %v30_v15 = vsub.f32 %v15_v1, %v28_v14 }
  0x82   :  { %v32_v16 = vmul.f32 %v30_v15, %v30_v15 }
  0x84   :  { %35 = vadd.xlane.f32.xlu1 %v32_v16 }
  0xef   :  { %v34_v17 = vpop.xlane.xlu1 %33 }
  0xf0   :  { %v37_v18 = vmul.f32 %v34_v17, %v26_v8 }
  0xf2   :  { %v39_v19 = vadd.f32 1e-05, %v37_v18 }
  0xf4   :  { %86 = vrsqrt.f32 %v39_v19  ;;  %vm47_vm2 = vweird.f32 %v39_v19 }
  0xf7   :  { %v36_v20 = vpop.xlane.xlu1 %35 }
  0xf8   :  { %v38_v21 = vmul.f32 %v36_v20, %v26_v8 }
  0xfa   :  { %v87_v22 = vpop.eup %86  ;;  %v40_v23 = vadd.f32 1e-05, %v38_v21 }
  0xfb   :  { %v42_v24 = vmul.f32 %v87_v22, %v39_v19  ;;  %vm48_vm1 = vweird.f32 %v87_v22 }
  0xfc   :  { %88 = vrsqrt.f32 %v40_v23  ;;  %vm49_vm3 = vmor %vm47_vm2, %vm48_vm1  ;;  %vm57_vm5 = vweird.f32 %v40_v23 }
  0xfd   :  { %v43_v25 = vmul.f32 %v87_v22, %v42_v24 }
  0xff   :  { %v44_v26 = vmul.f32 0.5, %v43_v25 }
 0x101   :  { %v45_v27 = vsub.f32 1.5, %v44_v26 }
 0x102   :  { %v89_v28 = vpop.eup %88 }
 0x103   :  { %v46_v29 = vmul.f32 %v87_v22, %v45_v27  ;;  %v52_v30 = vmul.f32 %v89_v28, %v40_v23  ;;  %vm58_vm4 = vweird.f32 %v89_v28 }
 0x104   :  { %vm59_vm6 = vmor %vm57_vm5, %vm58_vm4 }
 0x105   :  { %v50_v32 = vsel %vm49_vm3, %v87_v22, %v46_v29  ;;  %v53_v33 = vmul.f32 %v89_v28, %v52_v30 }
 0x106   :  { %v61_v35 = vmul.f32 %v50_v32, %v29_v11 }
 0x107   :  { %v54_v36 = vmul.f32 0.5, %v53_v33 }
 0x108   :  { %v67_v37 = vmul.f32 %v82_v31, %v61_v35 }
 0x109   :  { %v55_v38 = vsub.f32 1.5, %v54_v36 }
 0x10a   :  { %v73_v39 = vadd.f32 %v83_v34, %v67_v37 }
 0x10b   :  { %v56_v40 = vmul.f32 %v89_v28, %v55_v38 }
 0x10c   :  { %75 = vst [vmem:[%s132_s3] sm:$0xff] %v73_v39 }
 0x10d   :  { %v60_v41 = vsel %vm59_vm6, %v89_v28, %v56_v40 }
 0x10e   :  { %v62_v42 = vmul.f32 %v60_v41, %v30_v15 }
 0x110   :  { %v68_v43 = vmul.f32 %v82_v31, %v62_v42 }
 0x112   :  { %v74_v44 = vadd.f32 %v83_v34, %v68_v43 }
 0x114   :  { %76 = vst [vmem:[%s132_s3 + $0x8] sm:$0xff] %v74_v44 }

// kernel: gpt2_forward.21
= control target key start
LH: loop header
LB: loop body
LE: loop exit
PB: predicated region body
PF: predicated region fallthrough
CT: control target
= control target key end

     0   :  { %s224_s1 = inlined_call_operand.vmem [shape: bf16[128,128], index: 1, kind: input, shape index: {}]   ;;  %s225_s2 = inlined_call_operand.vmem [shape: f32[1,128], index: 2, kind: input, shape index: {}]   ;;  %s226_s0 = inlined_call_operand.vmem [shape: f32[16,128], index: 0, kind: input, shape index: {}]   ;;  %s227_s3 = inlined_call_operand.vmem [shape: f32[16,128], index: 3, kind: output, shape index: {}]  }
   0x1   :  { %v163_v0 = vld [vmem:[%s224_s1 + $0x38] sm:$0xff]  ;;  %v162_v1 = vld [vmem:[%s224_s1 + $0x30] sm:$0xff]  ;;  %v161_v2 = vld [vmem:[%s224_s1 + $0x28] sm:$0xff] }
   0x2   :  { %89 = vmatpush.bf16.msra.mxu0 %v163_v0  ;;  %v160_v3 = vld [vmem:[%s224_s1 + $0x20] sm:$0xff]  ;;  %v159_v4 = vld [vmem:[%s224_s1 + $0x18] sm:$0xff]  ;;  %v158_v5 = vld [vmem:[%s224_s1 + $0x10] sm:$0xff] }
   0x3   :  { %v157_v6 = vld [vmem:[%s224_s1 + $0x8] sm:$0xff]  ;;  %v156_v7 = vld [vmem:[%s224_s1] sm:$0xff] }
   0x4   :  { %v22_v8 = vld [vmem:[%s226_s0] sm:$0xff]  ;;  %v23_v9 = vld [vmem:[%s226_s0 + $0x8] sm:$0xff] }
   0x5   :  { %v24_v10 = vpack.c.bf16 %v23_v9, %v22_v8  ;;  %v164_v11 = vld [vmem:[%s225_s2] ss:$0 sm:$0xff] }
   0x6   :  { %90 = vmatpush.bf16.msra.mxu0 %v162_v1 }
   0xa   :  { %91 = vmatpush.bf16.msra.mxu0 %v161_v2 }
   0xe   :  { %92 = vmatpush.bf16.msra.mxu0 %v160_v3 }
  0x12   :  { %93 = vmatpush.bf16.msra.mxu0 %v159_v4 }
  0x16   :  { %94 = vmatpush.bf16.msra.mxu0 %v158_v5 }
  0x1a   :  { %95 = vmatpush.bf16.msra.mxu0 %v157_v6 }
  0x1e   :  { %96 = vmatpush.bf16.msra.mxu0 %v156_v7 }
  0x21   :  { %97 = vmatmul.bf16.vlgmr.msra.gmra.mxu0 %v24_v10 }
  0x9e   :  { %v98_v12 = vpop.f32.mrf.mxu0 }
  0x9f   :  { %v116_v13 = vadd.f32 %v164_v11, %v98_v12 }
  0xa1   :  { %118 = vst [vmem:[%s227_s3] sm:$0xff] %v116_v13 }
  0xa6   :  { %v100_v14 = vpop.f32.mrf.mxu0 }
  0xa7   :  { %v117_v15 = vadd.f32 %v164_v11, %v100_v14 }
  0xa9   :  { %119 = vst [vmem:[%s227_s3 + $0x8] sm:$0xff] %v117_v15 }

// kernel: gpt2_forward.23
= control target key start
LH: loop header
LB: loop body
LE: loop exit
PB: predicated region body
PF: predicated region fallthrough
CT: control target
= control target key end

     0   :  { %s544_s15 = smov 0   ;;  %s546_s16 = smov 0   ;;  %s598_s0 = inlined_call_operand.vmem [shape: f32[8,8,32], index: 0, kind: input, shape index: {}]   ;;  %s599_s1 = inlined_call_operand.vmem [shape: f32[8,8,32], index: 1, kind: input, shape index: {}]   ;;  %s600_s2 = inlined_call_operand.vmem [shape: f32[8,8,32], index: 2, kind: input, shape index: {}]   ;;  %s601_s3 = inlined_call_operand.vmem [shape: f32[8,8], index: 3, kind: input, shape index: {}]   ;;  %s602_s4 = inlined_call_operand.vmem [shape: f32[8,8,32], index: 4, kind: output, shape index: {}]  }
   0x1   :  { %s548_s17 = smov 0  }
   0x2 LB: > { %s26_s18 = sadd.s32 1, %s513_s16  ;;  %p458_p0 = scmp.ge.s32.totalorder %s517_s17, 1  ;;  %s517_s17 = sphi %s548_s17, %s14_s17   ;;  %s513_s16 = sphi %s546_s16, %s604_s16   ;;  %s509_s15 = sphi %s544_s15, %s603_s15  }
   0x3   : > { %p28_p1 = scmp.ge.s32.totalorder %s26_s18, 8  ;;  %p207_p2 = scmp.lt.s32.totalorder %s517_s17, 9 }
   0x5   : > { %s606_s18 = smov (%p28_p1, %s26_s18), 0  ;;  %p208_p3 = pnand %p458_p0, %p207_p2 }
   0x6   : > { %p249_p4 = scmp.lt.s32.totalorder (!%p208_p3), %s509_s15, 7 }
   0x7   : > { %211 = sbr.rel (%p208_p3) target bundleno = 546 (0x222), region = 36 }
   0xc   : > { %s608_s15 = smov (!%p249_p4, %s509_s15), 7  ;;  %vm282_vm0 = vcmask 261120   ;;  %v303_v6 = vld [vmem:[%s601_s3] sm:$0xff]  ;;  %vm305_vm1 = vcmask 64512   ;;  %vm321_vm2 = vcmask 1043456  }
   0xd   : > { %s562_s19 = sshll.u32 %s608_s15, 3 }
   0xe   : > { %s259_s22 = scalar_lea.vmem %s599_s1, %s562_s19  ;;  %s255_s25 = scalar_lea.vmem %s598_s0, %s562_s19 }
   0xf   : > { %v278_v0 = vld [vmem:[%s259_s22] sm:$0xff]  ;;  %s263_s30 = scalar_lea.vmem %s600_s2, %s562_s19  ;;  %s274_s7 = scalar_lea.vmem %s602_s4, %s562_s19 }
  0x10   : > { %v279_v1 = vpack.c.bf16 %v278_v0, %v278_v0  ;;  %v276_v3 = vld [vmem:[%s255_s25] sm:$0xff] }
  0x11   : > { %v277_v4 = vpack.c.bf16 %v276_v3, %v276_v3  ;;  %v280_v16 = vld [vmem:[%s263_s30] sm:$0xff] }
  0x12   : > { %v287_v2 = vsel %vm282_vm0, %v279_v1, 0  ;;  %v281_v17 = vpack.c.bf16 %v280_v16, %v280_v16 }
  0x13   : > { %296 = vmatpush.bf16.xpose.msra.mxu0 %v287_v2 }
  0x14   : > { %v323_v18 = vsel %vm321_vm2, %v281_v17, 0 }
  0x15   : > { %332 = vmatpush.bf16.msra.mxu1 %v323_v18 }
  0x1a   : > { %463 = vmatmul.msk.bf16.vlgmr.msra.gmra.mxu0 %vm282_vm0, %v277_v4 }
  0x97   : > { %v298_v5 = vpop.f32.mrf.mxu0 }
  0x98   : > { %v302_v7 = vmul.f32 0.17677669, %v298_v5 }
  0x9a   : > { %v304_v8 = vadd.f32 %v303_v6, %v302_v7 }
  0x9c   : > { %v306_v9 = vsel %vm305_vm1, %v304_v8, -inf }
  0x9d   : > { %307 = vmax.xlane.f32.xlu0 %v306_v9 }
  0x9f   : > { %v300_v10 = vpop.f32.mrf.mxu0 }
 0x110   : > { %v308_v11 = vpop.xlane.xlu0 %307 }
 0x111   : > { %v309_v12 = vsub.f32 %v304_v8, %v308_v11 }
 0x113   : > { %v310_v13 = vmul.f32 1.442695, %v309_v12 }
 0x115   : > { %491 = vpow2.f32 %v310_v13 }
 0x11b   : > { %v492_v14 = vpop.eup %491 }
 0x11c   : > { %v312_v15 = vsel %vm305_vm1, %v492_v14, 0.0 }
 0x11d   : > { %313 = vadd.xlane.f32.xlu0 %v312_v15 }
 0x190   : > { %v314_v19 = vpop.xlane.xlu0 %313 }
 0x191   : > { %493 = vrcp.f32 %v314_v19 }
 0x197   : > { %v494_v20 = vpop.eup %493 }
 0x198   : > { %v316_v21 = vmul.f32 %v494_v20, %v492_v14 }
 0x19a   : > { %v317_v22 = vpack.c.bf16 %v316_v21, %v316_v21 }
 0x19c   : > { %464 = vmatmul.msk.bf16.vlgmr.msra.gmra.mxu1 %vm305_vm1, %v317_v22 }
 0x219   : > { %v334_v23 = vpop.f32.mrf.mxu1 }
 0x21a   : > { %338 = vst.msk [vmem:[%s274_s7] sm:$0xff] %vm282_vm0, %v334_v23 }
 0x221   : > { %v336_v24 = vpop.f32.mrf.mxu1 }
 0x222 PF: > { %s14_s17 = sadd.s32 1, %s517_s17   ;;  %s603_s15 = smov %s513_s16 }
 0x223   : > { %p11_p5 = scmp.ge.s32.totalorder %s14_s17, 10   ;;  %s604_s16 = smov %s606_s18 }
 0x225   :  { %13 = sbr.rel (!%p11_p5) target bundleno = 2 (0x2), region = 75 }

// kernel: gpt2_forward.24
= control target key start
LH: loop header
LB: loop body
LE: loop exit
PB: predicated region body
PF: predicated region fallthrough
CT: control target
= control target key end

     0   :  { %s242_s1 = inlined_call_operand.vmem [shape: bf16[128,128], index: 1, kind: input, shape index: {}]   ;;  %s243_s2 = inlined_call_operand.vmem [shape: f32[1,128], index: 2, kind: input, shape index: {}]   ;;  %s244_s0 = inlined_call_operand.vmem [shape: f32[16,128], index: 0, kind: input, shape index: {}]   ;;  %s245_s3 = inlined_call_operand.vmem [shape: f32[16,128], index: 3, kind: input, shape index: {}]   ;;  %s246_s4 = inlined_call_operand.vmem [shape: f32[16,128], index: 4, kind: output, shape index: {}]  }
   0x1   :  { %v170_v0 = vld [vmem:[%s242_s1 + $0x38] sm:$0xff]  ;;  %v169_v1 = vld [vmem:[%s242_s1 + $0x30] sm:$0xff]  ;;  %v168_v2 = vld [vmem:[%s242_s1 + $0x28] sm:$0xff] }
   0x2   :  { %92 = vmatpush.bf16.msra.mxu0 %v170_v0  ;;  %v167_v3 = vld [vmem:[%s242_s1 + $0x20] sm:$0xff]  ;;  %v166_v4 = vld [vmem:[%s242_s1 + $0x18] sm:$0xff]  ;;  %v165_v5 = vld [vmem:[%s242_s1 + $0x10] sm:$0xff] }
   0x3   :  { %v164_v6 = vld [vmem:[%s242_s1 + $0x8] sm:$0xff]  ;;  %v163_v7 = vld [vmem:[%s242_s1] sm:$0xff] }
   0x4   :  { %v25_v8 = vld [vmem:[%s244_s0] sm:$0xff]  ;;  %v26_v9 = vld [vmem:[%s244_s0 + $0x8] sm:$0xff] }
   0x5   :  { %v27_v10 = vpack.c.bf16 %v26_v9, %v25_v8  ;;  %v171_v11 = vld [vmem:[%s243_s2] ss:$0 sm:$0xff]  ;;  %v122_v17 = vld [vmem:[%s245_s3 + $0x8] sm:$0xff] }
   0x6   :  { %93 = vmatpush.bf16.msra.mxu0 %v169_v1  ;;  %v121_v13 = vld [vmem:[%s245_s3] sm:$0xff] }
   0xa   :  { %94 = vmatpush.bf16.msra.mxu0 %v168_v2 }
   0xe   :  { %95 = vmatpush.bf16.msra.mxu0 %v167_v3 }
  0x12   :  { %96 = vmatpush.bf16.msra.mxu0 %v166_v4 }
  0x16   :  { %97 = vmatpush.bf16.msra.mxu0 %v165_v5 }
  0x1a   :  { %98 = vmatpush.bf16.msra.mxu0 %v164_v6 }
  0x1e   :  { %99 = vmatpush.bf16.msra.mxu0 %v163_v7 }
  0x21   :  { %100 = vmatmul.bf16.vlgmr.msra.gmra.mxu0 %v27_v10 }
  0x9e   :  { %v101_v12 = vpop.f32.mrf.mxu0 }
  0x9f   :  { %v119_v14 = vadd.f32 %v171_v11, %v101_v12 }
  0xa1   :  { %v123_v15 = vadd.f32 %v121_v13, %v119_v14 }
  0xa3   :  { %125 = vst [vmem:[%s246_s4] sm:$0xff] %v123_v15 }
  0xa6   :  { %v103_v16 = vpop.f32.mrf.mxu0 }
  0xa7   :  { %v120_v18 = vadd.f32 %v171_v11, %v103_v16 }
  0xa9   :  { %v124_v19 = vadd.f32 %v122_v17, %v120_v18 }
  0xab   :  { %126 = vst [vmem:[%s246_s4 + $0x8] sm:$0xff] %v124_v19 }

// kernel: gpt2_forward.37
= control target key start
LH: loop header
LB: loop body
LE: loop exit
PB: predicated region body
PF: predicated region fallthrough
CT: control target
= control target key end

     0   :  { %s173_s0 = inlined_call_operand.vmem [shape: f32[16,128], index: 0, kind: input, shape index: {}]   ;;  %s174_s1 = inlined_call_operand.vmem [shape: f32[1,128], index: 1, kind: input, shape index: {}]   ;;  %s175_s2 = inlined_call_operand.vmem [shape: f32[1,128], index: 2, kind: input, shape index: {}]   ;;  %s176_s3 = inlined_call_operand.hbm [shape: f32[16,128], index: 3, kind: output, shape index: {}]  }
   0x1   :  { %v15_v0 = vld [vmem:[%s173_s0] sm:$0xff] }
   0x2   :  { %17 = vadd.xlane.f32.xlu0 %v15_v0 }
   0x3   :  { %8 = vsyncpa [#allocation3], 0  ;;  %v16_v1 = vld [vmem:[%s173_s0 + $0x8] sm:$0xff]  ;;  %v134_v2 = vmov 128.0   ;;  %v100_v31 = vld [vmem:[%s174_s1] ss:$0 sm:$0xff] }
   0x4   :  { %102 = vrcp.f32 %v134_v2  ;;  %v101_v35 = vld [vmem:[%s175_s2] ss:$0 sm:$0xff]  ;;  %s135_s1 = smov [#allocation2]   ;;  %s84_s22 = sshll.u32 %s176_s3, 4  ;;  %s85_s22 = int_to_ptr.hbm [resolvable:$true] %s84_s22 }
   0x5   :  { %s82_s19 = sshll.u32 %s135_s1, 4  ;;  %s136_s2 = smov 128   ;;  %s83_s19 = int_to_ptr.vmem [resolvable:$true] %s82_s19 }
   0x6   :  { %s137_s23 = smov 8  }
   0xa   :  { %19 = vadd.xlane.f32.xlu0 %v16_v1  ;;  %v103_v3 = vpop.eup %102 }
   0xb   :  { %v22_v4 = vmul.f32 128.0, %v103_v3  ;;  %vm26_vm0 = vweird.f32 %v103_v3 }
   0xd   :  { %v23_v5 = vsub.f32 1.0, %v22_v4 }
   0xf   :  { %v24_v6 = vmul.f32 %v103_v3, %v23_v5 }
  0x11   :  { %v25_v7 = vadd.f32 %v103_v3, %v24_v6 }
  0x13   :  { %v27_v8 = vsel %vm26_vm0, %v103_v3, %v25_v7 }
  0x75   :  { %v18_v9 = vpop.xlane.xlu0 %17 }
  0x76   :  { %v28_v10 = vmul.f32 %v27_v8, %v18_v9 }
  0x78   :  { %v30_v11 = vsub.f32 %v15_v0, %v28_v10 }
  0x7a   :  { %v32_v12 = vmul.f32 %v30_v11, %v30_v11 }
  0x7c   :  { %34 = vadd.xlane.f32.xlu1 %v32_v12 }
  0x7d   :  { %v20_v13 = vpop.xlane.xlu0 %19 }
  0x7e   :  { %v29_v14 = vmul.f32 %v27_v8, %v20_v13 }
  0x80   :  { %v31_v15 = vsub.f32 %v16_v1, %v29_v14 }
  0x82   :  { %v33_v16 = vmul.f32 %v31_v15, %v31_v15 }
  0x84   :  { %36 = vadd.xlane.f32.xlu1 %v33_v16 }
  0xef   :  { %v35_v17 = vpop.xlane.xlu1 %34 }
  0xf0   :  { %v38_v18 = vmul.f32 %v35_v17, %v27_v8 }
  0xf2   :  { %v40_v19 = vadd.f32 1e-05, %v38_v18 }
  0xf4   :  { %104 = vrsqrt.f32 %v40_v19  ;;  %vm48_vm2 = vweird.f32 %v40_v19 }
  0xf7   :  { %v37_v20 = vpop.xlane.xlu1 %36 }
  0xf8   :  { %v39_v21 = vmul.f32 %v37_v20, %v27_v8 }
  0xfa   :  { %v105_v22 = vpop.eup %104  ;;  %v41_v23 = vadd.f32 1e-05, %v39_v21 }
  0xfb   :  { %v43_v24 = vmul.f32 %v105_v22, %v40_v19  ;;  %vm49_vm1 = vweird.f32 %v105_v22 }
  0xfc   :  { %106 = vrsqrt.f32 %v41_v23  ;;  %vm50_vm3 = vmor %vm48_vm2, %vm49_vm1  ;;  %vm58_vm5 = vweird.f32 %v41_v23 }
  0xfd   :  { %v44_v25 = vmul.f32 %v105_v22, %v43_v24 }
  0xff   :  { %v45_v26 = vmul.f32 0.5, %v44_v25 }
 0x101   :  { %v46_v27 = vsub.f32 1.5, %v45_v26 }
 0x102   :  { %v107_v28 = vpop.eup %106 }
 0x103   :  { %v47_v29 = vmul.f32 %v105_v22, %v46_v27  ;;  %v53_v30 = vmul.f32 %v107_v28, %v41_v23  ;;  %vm59_vm4 = vweird.f32 %v107_v28 }
 0x104   :  { %vm60_vm6 = vmor %vm58_vm5, %vm59_vm4 }
 0x105   :  { %v51_v32 = vsel %vm50_vm3, %v105_v22, %v47_v29  ;;  %v54_v33 = vmul.f32 %v107_v28, %v53_v30 }
 0x106   :  { %v62_v34 = vmul.f32 %v51_v32, %v30_v11 }
 0x107   :  { %v55_v36 = vmul.f32 0.5, %v54_v33 }
 0x108   :  { %v68_v37 = vmul.f32 %v100_v31, %v62_v34 }
 0x109   :  { %v56_v38 = vsub.f32 1.5, %v55_v36 }
 0x10a   :  { %v74_v39 = vadd.f32 %v101_v35, %v68_v37 }
 0x10b   :  { %v57_v40 = vmul.f32 %v107_v28, %v56_v38 }
 0x10c   :  { %76 = vst [vmem:[#allocation2] sm:$0xff] %v74_v39 }
 0x10d   :  { %v61_v41 = vsel %vm60_vm6, %v107_v28, %v57_v40 }
 0x10e   :  { %v63_v42 = vmul.f32 %v61_v41, %v31_v15 }
 0x110   :  { %v69_v43 = vmul.f32 %v100_v31, %v63_v42 }
 0x112   :  { %v75_v44 = vadd.f32 %v101_v35, %v69_v43 }
 0x114   :  { %77 = vst [vmem:[#allocation2 + $0x8] sm:$0xff] %v75_v44 }
 0x115   :  { %90 = dma.vmem_to_hbm [thread:$0]  %s83_s19, 256, %s85_s22, [#allocation3], %s136_s2, %s136_s2, %s137_s23  }
 0x116   :  { %132 = dma.done.wait [#allocation3], 256  }
 0x117   :  { %133 = vsyncadd [#allocation3], 4294967040 }
 0x118   :  { %95 = vsyncpa [#allocation3], 1 }

// kernel: gpt2_forward.26
= control target key start
LH: loop header
LB: loop body
LE: loop exit
PB: predicated region body
PF: predicated region fallthrough
CT: control target
= control target key end

     0   :  { %s891_s12 = smov 0   ;;  %s893_s13 = smov 0   ;;  %s1029_s0 = inlined_call_operand.vmem [shape: f32[16,128], index: 0, kind: input, shape index: {}]   ;;  %s1030_s1 = inlined_call_operand.vmem [shape: bf16[128,512], index: 1, kind: input, shape index: {}]   ;;  %s1031_s2 = inlined_call_operand.vmem [shape: f32[1,512], index: 2, kind: input, shape index: {}]   ;;  %s1032_s3 = inlined_call_operand.vmem [shape: f32[16,512], index: 3, kind: output, shape index: {}]  }
   0x1   :  { %s895_s14 = smov 0   ;;  %s897_s15 = smov 0  }
   0x2   :  { %s899_s16 = smov 0  }
   0x3 LB: > { %s28_s17 = sadd.s32 1, %s865_s15  ;;  %s684_s18 = sadd.s32 4294967295, %s869_s16   ;;  %s869_s16 = sphi %s899_s16, %s13_s16   ;;  %s865_s15 = sphi %s897_s15, %s1037_s15   ;;  %s861_s14 = sphi %s895_s14, %s1036_s14   ;;  %s857_s13 = sphi %s893_s13, %s1035_s13   ;;  %s853_s12 = sphi %s891_s12, %s1034_s12  }
   0x4   : > { %p30_p0 = scmp.ge.s32.totalorder %s28_s17, 2  ;;  %p76_p1 = scmp.ne.s32.totalorder %s857_s13, %s853_s12 }
   0x5   : > { %p77_p2 = scmp.eq.s32.totalorder %s869_s16, 0  ;;  %p134_p4 = scmp.eq.s32.totalorder %s684_s18, 1 }
   0x6   : > { %s1039_s17 = smov (%p30_p0, %s28_s17), 0  ;;  %s69_s20 = sadd.s32 1, %s857_s13 }
   0x7   : > { %p78_p3 = por %p77_p2, %p76_p1  ;;  %s65_s19 = ssub.s32 %s865_s15, %s1039_s17 }
   0x8   : > { %p67_p5 = scmp.eq.s32.totalorder %s65_s19, 0  ;;  %p926_p6 = por %p134_p4, %p76_p1 }
   0x9   : > { %p688_p7 = scmp.ge.s32.totalorder %s869_s16, 2 }
   0xa   : > { %s931_s22 = scalar_select %p67_p5, %s857_s13, %s69_s20  }
   0xb   : > { %168 = sbr.rel (%p688_p7) target bundleno = 36 (0x24), region = 20 }
  0x10   : > { %171 = sbr.rel (!%p78_p3) target bundleno = 36 (0x24), region = 24  ;;  %s173_s23 = sand.u32 (%p78_p3), 1, %s857_s13  }
  0x11   : > { %s765_s24 = sshll.u32 (%p78_p3), %s865_s15, 3  ;;  %s689_s25 = sshll.u32 (%p78_p3), %s173_s23, 7 }
  0x12   : > { %s939_s28 = scalar_lea.vmem (%p78_p3), %s1030_s1, %s765_s24  ;;  %s175_s29 = scalar_lea.vmem (%p78_p3), [#allocation3], %s689_s25 }
  0x13   : > { %v240_v0 = vld [vmem:[%s939_s28] sm:$0xff] (%p78_p3)  ;;  %v242_v1 = vld [vmem:[%s939_s28 + $0x10] sm:$0xff] (%p78_p3) }
  0x14   : > { %v244_v2 = vld [vmem:[%s939_s28 + $0x20] sm:$0xff] (%p78_p3)  ;;  %241 = vst [vmem:[%s175_s29] sm:$0xff] (%p78_p3), %v240_v0  ;;  %v246_v3 = vld [vmem:[%s939_s28 + $0x30] sm:$0xff] (%p78_p3) }
  0x15   : > { %243 = vst [vmem:[%s175_s29 + $0x8] sm:$0xff] %v242_v1  ;;  %v248_v4 = vld [vmem:[%s939_s28 + $0x40] sm:$0xff]  ;;  %v250_v5 = vld [vmem:[%s939_s28 + $0x50] sm:$0xff] }
  0x16   : > { %245 = vst [vmem:[%s175_s29 + $0x10] sm:$0xff] %v244_v2  ;;  %v252_v6 = vld [vmem:[%s939_s28 + $0x60] sm:$0xff]  ;;  %v254_v7 = vld [vmem:[%s939_s28 + $0x70] sm:$0xff] }
  0x17   : > { %247 = vst [vmem:[%s175_s29 + $0x18] sm:$0xff] %v246_v3  ;;  %v256_v8 = vld [vmem:[%s939_s28 + $0x80] sm:$0xff]  ;;  %v258_v9 = vld [vmem:[%s939_s28 + $0x90] sm:$0xff] }
  0x18   : > { %249 = vst [vmem:[%s175_s29 + $0x20] sm:$0xff] %v248_v4  ;;  %v260_v10 = vld [vmem:[%s939_s28 + $0xa0] sm:$0xff]  ;;  %v262_v11 = vld [vmem:[%s939_s28 + $0xb0] sm:$0xff] }
  0x19   : > { %251 = vst [vmem:[%s175_s29 + $0x28] sm:$0xff] %v250_v5  ;;  %v264_v12 = vld [vmem:[%s939_s28 + $0xc0] sm:$0xff]  ;;  %v266_v13 = vld [vmem:[%s939_s28 + $0xd0] sm:$0xff] }
  0x1a   : > { %253 = vst [vmem:[%s175_s29 + $0x30] sm:$0xff] %v252_v6  ;;  %v268_v14 = vld [vmem:[%s939_s28 + $0xe0] sm:$0xff]  ;;  %v270_v15 = vld [vmem:[%s939_s28 + $0xf0] sm:$0xff] }
  0x1b   : > { %255 = vst [vmem:[%s175_s29 + $0x38] sm:$0xff] %v254_v7 }
  0x1c   : > { %257 = vst [vmem:[%s175_s29 + $0x40] sm:$0xff] %v256_v8 }
  0x1d   : > { %259 = vst [vmem:[%s175_s29 + $0x48] sm:$0xff] %v258_v9 }
  0x1e   : > { %261 = vst [vmem:[%s175_s29 + $0x50] sm:$0xff] %v260_v10 }
  0x1f   : > { %263 = vst [vmem:[%s175_s29 + $0x58] sm:$0xff] %v262_v11 }
  0x20   : > { %265 = vst [vmem:[%s175_s29 + $0x60] sm:$0xff] %v264_v12 }
  0x21   : > { %267 = vst [vmem:[%s175_s29 + $0x68] sm:$0xff] %v266_v13 }
  0x22   : > { %269 = vst [vmem:[%s175_s29 + $0x70] sm:$0xff] %v268_v14 }
  0x23   : > { %271 = vst [vmem:[%s175_s29 + $0x78] sm:$0xff] %v270_v15 }
  0x24 PF: > { %p692_p8 = scmp.ge.s32.totalorder %s869_s16, 1  ;;  %p284_p9 = scmp.lt.s32.totalorder %s869_s16, 3 }
  0x26   : > { %p285_p10 = pnand %p692_p8, %p284_p9 }
  0x27   : > { %s291_s30 = sand.u32 (!%p285_p10), 1, %s853_s12   ;;  %s695_s10 = sshll.u32 (!%p285_p10), %s861_s14, 1 }
  0x28   : > { %288 = sbr.rel (%p285_p10) target bundleno = 246 (0xf6), region = 66  ;;  %s693_s4 = sshll.u32 (!%p285_p10), %s291_s30, 7 }
  0x29   : > { %s962_s5 = scalar_lea.vmem (!%p285_p10), [#allocation3], %s693_s4  ;;  %p337_p11 = scmp.lt.s32.totalorder (!%p285_p10), %s695_s10, 3 }
  0x2a   : > { %s694_s20 = sshll.u32 (!%p285_p10), %s291_s30, 5 }
  0x2b   : > { %s324_s23 = scalar_lea.vmem (!%p285_p10), [#allocation4], %s694_s20 }
  0x2d   : > { %v754_v16 = vld [vmem:[%s962_s5 + $0x70] sm:$0xf]  ;;  %v781_v17 = vld [vmem:[%s962_s5 + $0x74] sm:$0xf0]  ;;  %v780_v18 = vld [vmem:[%s962_s5 + $0x74] sm:$0xf] }
  0x2e   : > { %v755_v19 = vor.u32 %v781_v17, %v754_v16  ;;  %v756_v20 = vld [vmem:[%s962_s5 + $0x78] sm:$0xf0]  ;;  %v746_v21 = vld [vmem:[%s962_s5 + $0x60] sm:$0xf]  ;;  %v779_v22 = vld [vmem:[%s962_s5 + $0x64] sm:$0xf0] }
  0x2f   : > { %v759_v23 = vor.u32 %v780_v18, %v756_v20  ;;  %v778_v24 = vld [vmem:[%s962_s5 + $0x64] sm:$0xf]  ;;  %v748_v25 = vld [vmem:[%s962_s5 + $0x68] sm:$0xf0]  ;;  %v747_v26 = vor.u32 %v779_v22, %v746_v21  ;;  %v738_v28 = vld [vmem:[%s962_s5 + $0x50] sm:$0xf] }
  0x30   : > { %454 = vmatpush.bf16.msra.mxu0 %v755_v19  ;;  %v751_v27 = vor.u32 %v778_v24, %v748_v25  ;;  %v777_v29 = vld [vmem:[%s962_s5 + $0x54] sm:$0xf0]  ;;  %v776_v30 = vld [vmem:[%s962_s5 + $0x54] sm:$0xf]  ;;  %v740_v31 = vld [vmem:[%s962_s5 + $0x58] sm:$0xf0] }
  0x31   : > { %468 = vmatpush.bf16.msra.mxu1 %v759_v23  ;;  %v739_v32 = vor.u32 %v777_v29, %v738_v28  ;;  %v743_v33 = vor.u32 %v776_v30, %v740_v31  ;;  %v730_v34 = vld [vmem:[%s962_s5 + $0x40] sm:$0xf]  ;;  %v775_v35 = vld [vmem:[%s962_s5 + $0x44] sm:$0xf0]  ;;  %v774_v36 = vld [vmem:[%s962_s5 + $0x44] sm:$0xf] }
  0x32   : > { %v732_v37 = vld [vmem:[%s962_s5 + $0x48] sm:$0xf0]  ;;  %v731_v38 = vor.u32 %v775_v35, %v730_v34  ;;  %v722_v40 = vld [vmem:[%s962_s5 + $0x30] sm:$0xf]  ;;  %v773_v41 = vld [vmem:[%s962_s5 + $0x34] sm:$0xf0] }
  0x33   : > { %v735_v39 = vor.u32 %v774_v36, %v732_v37  ;;  %v772_v42 = vld [vmem:[%s962_s5 + $0x34] sm:$0xf]  ;;  %v724_v43 = vld [vmem:[%s962_s5 + $0x38] sm:$0xf0]  ;;  %v723_v44 = vor.u32 %v773_v41, %v722_v40  ;;  %v714_v46 = vld [vmem:[%s962_s5 + $0x20] sm:$0xf] }
  0x34   : > { %455 = vmatpush.bf16.msra.mxu0 %v747_v26  ;;  %v727_v45 = vor.u32 %v772_v42, %v724_v43  ;;  %v771_v47 = vld [vmem:[%s962_s5 + $0x24] sm:$0xf0]  ;;  %v770_v48 = vld [vmem:[%s962_s5 + $0x24] sm:$0xf]  ;;  %v716_v49 = vld [vmem:[%s962_s5 + $0x28] sm:$0xf0] }
  0x35   : > { %469 = vmatpush.bf16.msra.mxu1 %v751_v27  ;;  %v715_v50 = vor.u32 %v771_v47, %v714_v46  ;;  %v719_v51 = vor.u32 %v770_v48, %v716_v49  ;;  %v706_v52 = vld [vmem:[%s962_s5 + $0x10] sm:$0xf]  ;;  %v769_v53 = vld [vmem:[%s962_s5 + $0x14] sm:$0xf0]  ;;  %v768_v54 = vld [vmem:[%s962_s5 + $0x14] sm:$0xf] }
  0x36   : > { %v708_v55 = vld [vmem:[%s962_s5 + $0x18] sm:$0xf0]  ;;  %v707_v56 = vor.u32 %v769_v53, %v706_v52  ;;  %v698_v58 = vld [vmem:[%s962_s5] sm:$0xf]  ;;  %v767_v59 = vld [vmem:[%s962_s5 + $0x4] sm:$0xf0] }
  0x37   : > { %v711_v57 = vor.u32 %v768_v54, %v708_v55  ;;  %v766_v60 = vld [vmem:[%s962_s5 + $0x4] sm:$0xf]  ;;  %v700_v61 = vld [vmem:[%s962_s5 + $0x8] sm:$0xf0]  ;;  %v699_v62 = vor.u32 %v767_v59, %v698_v58  ;;  %s1041_s10 = smov (!%p337_p11, %s695_s10), 3  ;;  %s782_s12 = sshll.u32 (%p926_p6), %s861_s14, 4 }
  0x38   : > { %456 = vmatpush.bf16.msra.mxu0 %v739_v32  ;;  %v355_v63 = vld [vmem:[%s1029_s0] sm:$0xff]  ;;  %v356_v0 = vld [vmem:[%s1029_s0 + $0x8] sm:$0xff]  ;;  %v703_v1 = vor.u32 %v766_v60, %v700_v61  ;;  %s339_s19 = scalar_lea.vmem %s1031_s2, %s1041_s10  ;;  %s559_s26 = scalar_lea.vmem (%p926_p6), %s1032_s3, %s782_s12 }
  0x39   : > { %470 = vmatpush.bf16.msra.mxu1 %v743_v33  ;;  %v357_v2 = vpack.c.bf16 %v356_v0, %v355_v63  ;;  %v497_v3 = vld [vmem:[%s339_s19] sm:$0x3] }
  0x3a   : > { %v499_v4 = vperm.slane %v497_v3, 0  ;;  %v500_v5 = vperm.slane %v497_v3, 1 }
  0x3c   : > { %457 = vmatpush.bf16.msra.mxu0 %v731_v38 }
  0x3d   : > { %471 = vmatpush.bf16.msra.mxu1 %v735_v39 }
  0x40   : > { %458 = vmatpush.bf16.msra.mxu0 %v723_v44 }
  0x41   : > { %472 = vmatpush.bf16.msra.mxu1 %v727_v45 }
  0x44   : > { %459 = vmatpush.bf16.msra.mxu0 %v715_v50 }
  0x45   : > { %473 = vmatpush.bf16.msra.mxu1 %v719_v51 }
  0x48   : > { %460 = vmatpush.bf16.msra.mxu0 %v707_v56 }
  0x49   : > { %474 = vmatpush.bf16.msra.mxu1 %v711_v57 }
  0x4c   : > { %461 = vmatpush.bf16.msra.mxu0 %v699_v62 }
  0x4d   : > { %475 = vmatpush.bf16.msra.mxu1 %v703_v1 }
  0x4f   : > { %462 = vmatmul.bf16.vlgmr.msra.gmra.mxu0 %v357_v2 }
  0x50   : > { %476 = vmatmul.bf16.vlgmr.msra.gmra.mxu1 %v357_v2 }
  0xcc   : > { %v463_v6 = vpop.f32.mrf.mxu0 }
  0xcd   : > { %v503_v7 = vadd.f32 %v499_v4, %v463_v6  ;;  %v477_v8 = vpop.f32.mrf.mxu1 }
  0xce   : > { %v504_v9 = vadd.f32 %v500_v5, %v477_v8 }
  0xcf   : > { %v511_v10 = vmul.f32 0.044715, %v503_v7  ;;  %v507_v35 = vmul.f32 0.5, %v503_v7 }
  0xd0   : > { %v512_v11 = vmul.f32 0.044715, %v504_v9  ;;  %v508_v38 = vmul.f32 0.5, %v504_v9 }
  0xd1   : > { %v515_v12 = vmul.f32 %v511_v10, %v503_v7 }
  0xd2   : > { %v516_v13 = vmul.f32 %v512_v11, %v504_v9 }
  0xd3   : > { %v519_v14 = vmul.f32 %v515_v12, %v503_v7 }
  0xd4   : > { %v520_v15 = vmul.f32 %v516_v13, %v504_v9  ;;  %v465_v16 = vpop.f32.mrf.mxu0 }
  0xd5   : > { %v523_v17 = vadd.f32 %v519_v14, %v503_v7  ;;  %v505_v18 = vadd.f32 %v499_v4, %v465_v16  ;;  %v479_v19 = vpop.f32.mrf.mxu1 }
  0xd6   : > { %v524_v20 = vadd.f32 %v520_v15, %v504_v9  ;;  %v506_v21 = vadd.f32 %v500_v5, %v479_v19 }
  0xd7   : > { %v527_v22 = vmul.f32 0.7978846, %v523_v17  ;;  %v513_v23 = vmul.f32 0.044715, %v505_v18  ;;  %v509_v44 = vmul.f32 0.5, %v505_v18 }
  0xd8   : > { %v528_v24 = vmul.f32 0.7978846, %v524_v20  ;;  %v514_v25 = vmul.f32 0.044715, %v506_v21  ;;  %v510_v46 = vmul.f32 0.5, %v506_v21 }
  0xd9   : > { %823 = vtanh.f32 %v527_v22  ;;  %v517_v26 = vmul.f32 %v513_v23, %v505_v18 }
  0xda   : > { %825 = vtanh.f32 %v528_v24  ;;  %v518_v27 = vmul.f32 %v514_v25, %v506_v21 }
  0xdb   : > { %v521_v28 = vmul.f32 %v517_v26, %v505_v18 }
  0xdc   : > { %v522_v29 = vmul.f32 %v518_v27, %v506_v21 }
  0xdd   : > { %v525_v30 = vadd.f32 %v521_v28, %v505_v18 }
  0xde   : > { %v526_v31 = vadd.f32 %v522_v29, %v506_v21 }
  0xdf   : > { %v824_v32 = vpop.eup %823  ;;  %v529_v33 = vmul.f32 0.7978846, %v525_v30 }
  0xe0   : > { %v826_v34 = vpop.eup %825  ;;  %v535_v36 = vadd.f32 1.0, %v824_v32  ;;  %v530_v37 = vmul.f32 0.7978846, %v526_v31 }
  0xe1   : > { %v536_v39 = vadd.f32 1.0, %v826_v34  ;;  %827 = vtanh.f32 %v529_v33 }
  0xe2   : > { %v539_v40 = vmul.f32 %v535_v36, %v507_v35  ;;  %829 = vtanh.f32 %v530_v37 }
  0xe3   : > { %v540_v41 = vmul.f32 %v536_v39, %v508_v38 }
  0xe4   : > { %543 = vst [vmem:[%s324_s23] sm:$0xff] %v539_v40 }
  0xe5   : > { %544 = vst [vmem:[%s324_s23 + $0x8] sm:$0xff] %v540_v41 }
  0xe7   : > { %v828_v42 = vpop.eup %827 }
  0xe8   : > { %v830_v43 = vpop.eup %829  ;;  %v537_v45 = vadd.f32 1.0, %v828_v42 }
  0xe9   : > { %v538_v47 = vadd.f32 1.0, %v830_v43  ;;  %553 = sbr.rel (!%p926_p6) target bundleno = 246 (0xf6), region = 82 }
  0xea   : > { %v541_v48 = vmul.f32 %v537_v45, %v509_v44 }
  0xeb   : > { %v542_v49 = vmul.f32 %v538_v47, %v510_v46  ;;  %v572_v50 = vld [vmem:[%s324_s23] sm:$0xff] (%p926_p6) }
  0xec   : > { %545 = vst [vmem:[%s324_s23 + $0x10] sm:$0xff] %v541_v48  ;;  %v574_v51 = vld [vmem:[%s324_s23 + $0x8] sm:$0xff] (%p926_p6) }
  0xed   : > { %546 = vst [vmem:[%s324_s23 + $0x18] sm:$0xff] %v542_v49 }
  0xee   : > { %573 = vst [vmem:[%s559_s26] sm:$0xff] %v572_v50 }
  0xef   : > { %575 = vst [vmem:[%s559_s26 + $0x8] sm:$0xff] %v574_v51 }
  0xf3   : > { %v576_v52 = vld [vmem:[%s324_s23 + $0x10] sm:$0xff] }
  0xf4   : > { %v578_v53 = vld [vmem:[%s324_s23 + $0x18] sm:$0xff]  ;;  %577 = vst [vmem:[%s559_s26 + $0x20] sm:$0xff] %v576_v52 }
  0xf5   : > { %579 = vst [vmem:[%s559_s26 + $0x28] sm:$0xff] %v578_v53 }
  0xf6 PF: > { %s13_s16 = sadd.s32 1, %s869_s16   ;;  %s1034_s12 = smov %s857_s13 }
  0xf7   : > { %p10_p12 = scmp.ge.s32.totalorder %s13_s16, 4   ;;  %s1035_s13 = smov %s931_s22 }
  0xf8   : > { %s1036_s14 = smov %s865_s15  ;;  %s1037_s15 = smov %s1039_s17 }
  0xf9   :  { %12 = sbr.rel (!%p10_p12) target bundleno = 3 (0x3), region = 142 }

// kernel: gpt2_forward.27
= control target key start
LH: loop header
LB: loop body
LE: loop exit
PB: predicated region body
PF: predicated region fallthrough
CT: control target
= control target key end

     0   :  { %s695_s1 = inlined_call_operand.vmem [shape: bf16[512,128], index: 1, kind: input, shape index: {}]   ;;  %s696_s0 = inlined_call_operand.vmem [shape: f32[16,512], index: 0, kind: input, shape index: {}]   ;;  %s697_s2 = inlined_call_operand.vmem [shape: f32[1,128], index: 2, kind: input, shape index: {}]   ;;  %s698_s3 = inlined_call_operand.vmem [shape: f32[16,128], index: 3, kind: input, shape index: {}]   ;;  %s699_s4 = inlined_call_operand.vmem [shape: f32[16,128], index: 4, kind: output, shape index: {}]  }
   0x1   :  { %v509_v0 = vld [vmem:[%s695_s1 + $0x38] sm:$0xff]  ;;  %v508_v4 = vld [vmem:[%s695_s1 + $0x30] sm:$0xff]  ;;  %v507_v8 = vld [vmem:[%s695_s1 + $0x28] sm:$0xff] }
   0x2   :  { %v517_v1 = vld [vmem:[%s695_s1 + $0x78] sm:$0xff]  ;;  %293 = vmatpush.bf16.msra.mxu0 %v509_v0  ;;  %v516_v5 = vld [vmem:[%s695_s1 + $0x70] sm:$0xff]  ;;  %v515_v9 = vld [vmem:[%s695_s1 + $0x68] sm:$0xff] }
   0x3   :  { %v525_v2 = vld [vmem:[%s695_s1 + $0xb8] sm:$0xff]  ;;  %307 = vmatpush.bf16.msra.mxu1 %v517_v1  ;;  %v524_v6 = vld [vmem:[%s695_s1 + $0xb0] sm:$0xff]  ;;  %v523_v10 = vld [vmem:[%s695_s1 + $0xa8] sm:$0xff] }
   0x4   :  { %v533_v3 = vld [vmem:[%s695_s1 + $0xf8] sm:$0xff]  ;;  %321 = vmatpush.bf16.msra.mxu2 %v525_v2  ;;  %v532_v7 = vld [vmem:[%s695_s1 + $0xf0] sm:$0xff]  ;;  %v531_v11 = vld [vmem:[%s695_s1 + $0xe8] sm:$0xff] }
   0x5   :  { %335 = vmatpush.bf16.msra.mxu3 %v533_v3  ;;  %v506_v12 = vld [vmem:[%s695_s1 + $0x20] sm:$0xff]  ;;  %v505_v16 = vld [vmem:[%s695_s1 + $0x18] sm:$0xff]  ;;  %v504_v20 = vld [vmem:[%s695_s1 + $0x10] sm:$0xff] }
   0x6   :  { %294 = vmatpush.bf16.msra.mxu0 %v508_v4  ;;  %v514_v13 = vld [vmem:[%s695_s1 + $0x60] sm:$0xff]  ;;  %v513_v17 = vld [vmem:[%s695_s1 + $0x58] sm:$0xff]  ;;  %v512_v21 = vld [vmem:[%s695_s1 + $0x50] sm:$0xff] }
   0x7   :  { %308 = vmatpush.bf16.msra.mxu1 %v516_v5  ;;  %v522_v14 = vld [vmem:[%s695_s1 + $0xa0] sm:$0xff]  ;;  %v521_v18 = vld [vmem:[%s695_s1 + $0x98] sm:$0xff]  ;;  %v520_v22 = vld [vmem:[%s695_s1 + $0x90] sm:$0xff] }
   0x8   :  { %322 = vmatpush.bf16.msra.mxu2 %v524_v6  ;;  %v530_v15 = vld [vmem:[%s695_s1 + $0xe0] sm:$0xff]  ;;  %v529_v19 = vld [vmem:[%s695_s1 + $0xd8] sm:$0xff]  ;;  %v528_v23 = vld [vmem:[%s695_s1 + $0xd0] sm:$0xff] }
   0x9   :  { %336 = vmatpush.bf16.msra.mxu3 %v532_v7  ;;  %v503_v24 = vld [vmem:[%s695_s1 + $0x8] sm:$0xff]  ;;  %v502_v28 = vld [vmem:[%s695_s1] sm:$0xff]  ;;  %v27_v36 = vld [vmem:[%s696_s0 + $0x10] sm:$0xff] }
   0xa   :  { %295 = vmatpush.bf16.msra.mxu0 %v507_v8  ;;  %v511_v25 = vld [vmem:[%s695_s1 + $0x48] sm:$0xff]  ;;  %v510_v29 = vld [vmem:[%s695_s1 + $0x40] sm:$0xff]  ;;  %v31_v37 = vld [vmem:[%s696_s0 + $0x30] sm:$0xff] }
   0xb   :  { %309 = vmatpush.bf16.msra.mxu1 %v515_v9  ;;  %v519_v26 = vld [vmem:[%s695_s1 + $0x88] sm:$0xff]  ;;  %v518_v30 = vld [vmem:[%s695_s1 + $0x80] sm:$0xff]  ;;  %v28_v38 = vld [vmem:[%s696_s0 + $0x18] sm:$0xff]  ;;  %v35_v42 = vpack.c.bf16 %v31_v37, %v27_v36 }
   0xc   :  { %323 = vmatpush.bf16.msra.mxu2 %v523_v10  ;;  %v527_v27 = vld [vmem:[%s695_s1 + $0xc8] sm:$0xff]  ;;  %v526_v31 = vld [vmem:[%s695_s1 + $0xc0] sm:$0xff]  ;;  %v32_v39 = vld [vmem:[%s696_s0 + $0x38] sm:$0xff] }
   0xd   :  { %337 = vmatpush.bf16.msra.mxu3 %v531_v11  ;;  %v25_v32 = vld [vmem:[%s696_s0] sm:$0xff]  ;;  %v26_v34 = vld [vmem:[%s696_s0 + $0x8] sm:$0xff]  ;;  %v36_v43 = vpack.c.bf16 %v32_v39, %v28_v38 }
   0xe   :  { %296 = vmatpush.bf16.msra.mxu0 %v506_v12  ;;  %v29_v33 = vld [vmem:[%s696_s0 + $0x20] sm:$0xff]  ;;  %v30_v35 = vld [vmem:[%s696_s0 + $0x28] sm:$0xff] }
   0xf   :  { %310 = vmatpush.bf16.msra.mxu1 %v514_v13  ;;  %v33_v40 = vpack.c.bf16 %v29_v33, %v25_v32  ;;  %v34_v41 = vpack.c.bf16 %v30_v35, %v26_v34  ;;  %v534_v50 = vld [vmem:[%s697_s2] ss:$0 sm:$0xff]  ;;  %v365_v62 = vld [vmem:[%s698_s3 + $0x8] sm:$0xff] }
  0x10   :  { %324 = vmatpush.bf16.msra.mxu2 %v522_v14  ;;  %v364_v52 = vld [vmem:[%s698_s3] sm:$0xff] }
  0x11   :  { %338 = vmatpush.bf16.msra.mxu3 %v530_v15 }
  0x12   :  { %297 = vmatpush.bf16.msra.mxu0 %v505_v16 }
  0x13   :  { %311 = vmatpush.bf16.msra.mxu1 %v513_v17 }
  0x14   :  { %325 = vmatpush.bf16.msra.mxu2 %v521_v18 }
  0x15   :  { %339 = vmatpush.bf16.msra.mxu3 %v529_v19 }
  0x16   :  { %298 = vmatpush.bf16.msra.mxu0 %v504_v20 }
  0x17   :  { %312 = vmatpush.bf16.msra.mxu1 %v512_v21 }
  0x18   :  { %326 = vmatpush.bf16.msra.mxu2 %v520_v22 }
  0x19   :  { %340 = vmatpush.bf16.msra.mxu3 %v528_v23 }
  0x1a   :  { %299 = vmatpush.bf16.msra.mxu0 %v503_v24 }
  0x1b   :  { %313 = vmatpush.bf16.msra.mxu1 %v511_v25 }
  0x1c   :  { %327 = vmatpush.bf16.msra.mxu2 %v519_v26 }
  0x1d   :  { %341 = vmatpush.bf16.msra.mxu3 %v527_v27 }
  0x1e   :  { %300 = vmatpush.bf16.msra.mxu0 %v502_v28 }
  0x1f   :  { %314 = vmatpush.bf16.msra.mxu1 %v510_v29 }
  0x20   :  { %328 = vmatpush.bf16.msra.mxu2 %v518_v30 }
  0x21   :  { %342 = vmatpush.bf16.msra.mxu3 %v526_v31  ;;  %301 = vmatmul.bf16.vlgmr.msra.gmra.mxu0 %v33_v40 }
  0x22   :  { %315 = vmatmul.bf16.vlgmr.msra.gmra.mxu1 %v34_v41 }
  0x23   :  { %329 = vmatmul.bf16.vlgmr.msra.gmra.mxu2 %v35_v42 }
  0x24   :  { %343 = vmatmul.bf16.vlgmr.msra.gmra.mxu3 %v36_v43 }
  0x9e   :  { %v302_v44 = vpop.f32.mrf.mxu0 }
  0x9f   :  { %v316_v45 = vpop.f32.mrf.mxu1 }
  0xa0   :  { %v317_v46 = vadd.f32 %v316_v45, %v302_v44 }
  0xa6   :  { %v330_v47 = vpop.f32.mrf.mxu2  ;;  %v304_v53 = vpop.f32.mrf.mxu0 }
  0xa7   :  { %v344_v48 = vpop.f32.mrf.mxu3  ;;  %v331_v49 = vadd.f32 %v330_v47, %v317_v46  ;;  %v318_v54 = vpop.f32.mrf.mxu1 }
  0xa8   :  { %v319_v57 = vadd.f32 %v318_v54, %v304_v53 }
  0xa9   :  { %v345_v51 = vadd.f32 %v344_v48, %v331_v49 }
  0xab   :  { %v362_v55 = vadd.f32 %v534_v50, %v345_v51 }
  0xad   :  { %v366_v56 = vadd.f32 %v364_v52, %v362_v55 }
  0xae   :  { %v332_v58 = vpop.f32.mrf.mxu2 }
  0xaf   :  { %368 = vst [vmem:[%s699_s4] sm:$0xff] %v366_v56  ;;  %v333_v59 = vadd.f32 %v332_v58, %v319_v57  ;;  %v346_v60 = vpop.f32.mrf.mxu3 }
  0xb1   :  { %v347_v61 = vadd.f32 %v346_v60, %v333_v59 }
  0xb3   :  { %v363_v63 = vadd.f32 %v534_v50, %v347_v61 }
  0xb5   :  { %v367_v0 = vadd.f32 %v365_v62, %v363_v63 }
  0xb7   :  { %369 = vst [vmem:[%s699_s4 + $0x8] sm:$0xff] %v367_v0 }

</bundles_post_ra>
